<compile_context>
chip_gen: v7x
topology: tpu7x:2x2x1
jax: 0.10.0
libtpu: 0.0.40
codegen_flags: <defaults>
</compile_context>

<pallas_src>
import functools

import jax
import jax.numpy as jnp
from jax import lax
from jax.experimental import pallas as pl
from jax.experimental.pallas import tpu as pltpu


def _full_spec(shape):
    nd = len(shape)
    return pl.BlockSpec(shape, lambda i, _nd=nd: (0,) * _nd)


# ---------------------------------------------------------------------------
# Fused forward kernel.
# ---------------------------------------------------------------------------
def _fused_kernel(colsT_ref, cw_ref, cb_ref, rw_ref, rb_ref, x_ref, wih_ref,
                  whh_ref, lb_ref, w1a_ref, w1b_ref, b1_ref, w2_ref, b2_ref,
                  out_ref, flat_ref, *, batch, pos, q_channels, seq, hidden):
    f32 = jnp.float32

    # ---- stage 1: both image encoders as ONE block-diagonal matmul ---------
    # (2*C_enc, 2*C_in*KH*KW) @ (2*C_in*KH*KW, B*OH*OW) -> (16, 128), lane-dense.
    feat = jnp.dot(cw_ref[...], colsT_ref[...], preferred_element_type=f32)
    feat = jnp.maximum(feat + cb_ref[...], 0.0)                      # ReLU

    # ---- stage 2: torch.cat(dim=1) + nn.Flatten() + reduction Linear -------
    # Scatter feat[q, b*pos + p] -> flat[b, q*pos + p]  (channel-major flatten,
    # identical to PyTorch order).  32 tiny static VMEM stores, done once.
    for q in range(q_channels):
        for b in range(batch):
            flat_ref[b:b + 1, q * pos:(q + 1) * pos] = \
                feat[q:q + 1, b * pos:(b + 1) * pos]
    reduced = (jnp.dot(flat_ref[...], rw_ref[...], preferred_element_type=f32)
               + rb_ref[...])                                        # (B, img_emb)

    # ---- stage 3: LSTM over the embedded attribute caption -----------------
    # Hoisted input-to-hidden matmul: one (T*B, E) @ (E, 4H) MXU push.
    gx = jnp.dot(x_ref[...], wih_ref[...], preferred_element_type=f32) + lb_ref[...]
    whh = whh_ref[...]
    h = jnp.zeros((batch, hidden), f32)
    c = jnp.zeros((batch, hidden), f32)
    for t in range(seq):                       # statically unrolled (T fixed)
        g = (gx[t * batch:(t + 1) * batch, :]
             + jnp.dot(h, whh, preferred_element_type=f32))          # (B, 4H)
        s = jax.nn.sigmoid(g)                  # one EUP pass covers i, f, o
        i_gate = s[:, 0:hidden]
        f_gate = s[:, hidden:2 * hidden]
        o_gate = s[:, 3 * hidden:4 * hidden]
        g_gate = jnp.tanh(g[:, 2 * hidden:3 * hidden])
        c = f_gate * c + i_gate * g_gate
        h = o_gate * jnp.tanh(c)               # h == hidden_state.squeeze()

    # ---- stage 4: cat((reduced, hidden), dim=1) + coordinate classifier ----
    # Split-weight matmul instead of a concat.
    z = (jnp.dot(reduced, w1a_ref[...], preferred_element_type=f32)
         + jnp.dot(h, w1b_ref[...], preferred_element_type=f32)
         + b1_ref[...])
    z = jnp.maximum(z, 0.0)
    out_ref[...] = jnp.dot(z, w2_ref[...], preferred_element_type=f32) + b2_ref[...]


# ---------------------------------------------------------------------------
# Glue: im2col (NCHW -> (B*OH*OW, C_in*KH*KW)); column order matches the
# PyTorch conv weight layout (C_out, C_in, KH, KW).reshape(C_out, -1).
# ---------------------------------------------------------------------------
def im2col(x_nchw, kh, kw, stride, pad):
    B, C, H, W = x_nchw.shape
    xp = jnp.pad(x_nchw, ((0, 0), (0, 0), (pad, pad), (pad, pad)))
    OH = (H + 2 * pad - kh) // stride + 1
    OW = (W + 2 * pad - kw) // stride + 1
    cols = []
    for i in range(kh):
        for j in range(kw):
            cols.append(
                xp[:, :, i:i + stride * (OH - 1) + 1:stride,
                         j:j + stride * (OW - 1) + 1:stride])         # (B,C,OH,OW)
    cols = jnp.stack(cols, axis=2)                                    # (B,C,KH*KW,OH,OW)
    cols = jnp.transpose(cols, (0, 3, 4, 1, 2))                       # (B,OH,OW,C,KH*KW)
    return cols.reshape(B * OH * OW, C * kh * kw), OH, OW


# ---------------------------------------------------------------------------
# Forward wrapper: builds the fused operands and launches one pallas_call.
# ---------------------------------------------------------------------------
def masked_dale_forward(params, image, attribute_tensor, masked_image):
    B = image.shape[0]
    c_enc = params["conv1_w"].shape[0]
    k_dim = params["conv1_w"].shape[1] * 9

    # im2col for both encoders, transposed so positions sit on the 128-lane axis.
    cols_img, OH, OW = im2col(image, 3, 3, stride=2, pad=1)           # (B*OH*OW, C_in*9)
    cols_msk, _, _ = im2col(masked_image, 3, 3, stride=2, pad=1)
    colsT_all = jnp.concatenate([cols_img.T, cols_msk.T], axis=0)     # (2*C_in*9, B*OH*OW)

    # Block-diagonal conv weight == two independent convolutions in one matmul.
    w1 = params["conv1_w"].reshape(c_enc, k_dim)
    w2 = params["conv2_w"].reshape(c_enc, k_dim)
    zero = jnp.zeros((c_enc, k_dim), jnp.float32)
    conv_w = jnp.concatenate(
        [jnp.concatenate([w1, zero], axis=1),
         jnp.concatenate([zero, w2], axis=1)], axis=0)                # (2*C_enc, 2*C_in*9)
    conv_b = jnp.concatenate(
        [params["conv1_b"], params["conv2_b"]]).reshape(2 * c_enc, 1)

    # Embedding lookup (gather glue), time-major for the hoisted LSTM matmul.
    emb = params["emb_table"][attribute_tensor]                       # (B, T, E)
    T = emb.shape[1]
    x_all = jnp.transpose(emb, (1, 0, 2)).reshape(T * B, -1)          # (T*B, E)

    hidden = params["w_hh"].shape[1]
    lstm_b = (params["b_ih"] + params["b_hh"]).reshape(1, 4 * hidden)

    img_emb = params["red_w"].shape[1]
    cls_wa = params["cls1_w"][:img_emb]                               # rows for `reduced`
    cls_wb = params["cls1_w"][img_emb:]                               # rows for LSTM hidden

    operands = (
        colsT_all, conv_w, conv_b,
        params["red_w"], params["red_b"].reshape(1, -1),
        x_all, params["w_ih"].T, params["w_hh"].T, lstm_b,
        cls_wa, cls_wb, params["cls1_b"].reshape(1, -1),
        params["cls2_w"], params["cls2_b"].reshape(1, -1),
    )

    kernel = functools.partial(
        _fused_kernel, batch=B, pos=OH * OW, q_channels=2 * c_enc,
        seq=T, hidden=hidden)

    return pl.pallas_call(
        kernel,
        out_shape=jax.ShapeDtypeStruct((B, 2), jnp.float32),
        grid=(1,),
        in_specs=[_full_spec(op.shape) for op in operands],
        out_specs=_full_spec((B, 2)),
        scratch_shapes=[pltpu.VMEM((B, 2 * c_enc * OH * OW), jnp.float32)],
        compiler_params=pltpu.CompilerParams(
            dimension_semantics=("arbitrary",),
            vmem_limit_bytes=32 * 1024 * 1024),
    )(*operands)


# ---------------------------------------------------------------------------
# Pure-JAX reference of the same forward (for correctness checking).
# ---------------------------------------------------------------------------
def reference_forward(params, image, attribute_tensor, masked_image):
    hp = lax.Precision.HIGHEST

    def encode(x, w, b):
        y = lax.conv_general_dilated(
            x, w, window_strides=(2, 2), padding=((1, 1), (1, 1)),
            dimension_numbers=("NCHW", "OIHW", "NCHW"), precision=hp)
        return jnp.maximum(y + b.reshape(1, -1, 1, 1), 0.0)

    B = image.shape[0]
    enc_i = encode(image, params["conv1_w"], params["conv1_b"])
    enc_m = encode(masked_image, params["conv2_w"], params["conv2_b"])
    flat = jnp.concatenate([enc_i, enc_m], axis=1).reshape(B, -1)
    reduced = jnp.dot(flat, params["red_w"], precision=hp) + params["red_b"]

    emb = params["emb_table"][attribute_tensor]                       # (B, T, E)
    H = params["w_hh"].shape[1]
    wih, whh = params["w_ih"].T, params["w_hh"].T
    bias = params["b_ih"] + params["b_hh"]
    hs = jnp.zeros((B, H), jnp.float32)
    cs = jnp.zeros((B, H), jnp.float32)
    for t in range(emb.shape[1]):
        g = (jnp.dot(emb[:, t, :], wih, precision=hp)
             + jnp.dot(hs, whh, precision=hp) + bias)
        i = jax.nn.sigmoid(g[:, :H])
        f = jax.nn.sigmoid(g[:, H:2 * H])
        gg = jnp.tanh(g[:, 2 * H:3 * H])
        o = jax.nn.sigmoid(g[:, 3 * H:])
        cs = f * cs + i * gg
        hs = o * jnp.tanh(cs)

    cat = jnp.concatenate([reduced, hs], axis=1)
    z = jnp.maximum(jnp.dot(cat, params["cls1_w"], precision=hp)
                    + params["cls1_b"], 0.0)
    return jnp.dot(z, params["cls2_w"], precision=hp) + params["cls2_b"]


# ---------------------------------------------------------------------------
# Parameter init (deterministic, synthetic).
# ---------------------------------------------------------------------------
def init_params(key, *, in_channels, enc_channels, feat_hw, vocab, emb, enc_out,
                image_embedding, cls_hidden):
    keys = jax.random.split(key, 15)
    s = 0.1
    flat_dim = 2 * enc_channels * feat_hw * feat_hw   # cat(dim=1) of both encoders, flattened

    def n(k, shape):
        return jax.random.normal(k, shape, jnp.float32) * s

    return dict(
        # TODO(synk): ImageEncoder is not defined in the provided source; it is
        # synthesized as Conv2d(C_in -> enc_channels, k=3, s=2, p=1) + ReLU.
        conv1_w=n(keys[0], (enc_channels, in_channels, 3, 3)),
        conv1_b=n(keys[1], (enc_channels,)),
        conv2_w=n(keys[2], (enc_channels, in_channels, 3, 3)),   # masked_image_encoder
        conv2_b=n(keys[3], (enc_channels,)),
        # reduction = nn.Flatten() + nn.LazyLinear(image_embedding)
        red_w=n(keys[4], (flat_dim, image_embedding)),
        red_b=n(keys[5], (image_embedding,)),
        emb_table=n(keys[6], (vocab, emb)),
        # nn.LSTM(emb, enc_out, batch_first=True): PyTorch i,f,g,o gate order.
        w_ih=n(keys[7], (4 * enc_out, emb)),
        w_hh=n(keys[8], (4 * enc_out, enc_out)),
        b_ih=n(keys[9], (4 * enc_out,)),
        b_hh=n(keys[10], (4 * enc_out,)),
        # TODO(synk): CoordinateClassifier is not defined in the provided source;
        # synthesized as LazyLinear(cls_hidden) -> ReLU -> Linear(cls_hidden, 2).
        cls1_w=n(keys[11], (image_embedding + enc_out, cls_hidden)),
        cls1_b=n(keys[12], (cls_hidden,)),
        cls2_w=n(keys[13], (cls_hidden, 2)),
        cls2_b=n(keys[14], (2,)),
    )


if __name__ == "__main__":
    B, C_in, Himg, Wimg = 2, 4, 16, 16      # image: NCHW
    enc_channels = 8                         # ImageEncoder output channels
    vocab, emb_dim, enc_out = 16, 32, 32     # encoder_vocab_size / embedding / encoder_out
    image_embedding = 16
    cls_hidden = 64
    seq = 8

    key = jax.random.PRNGKey(0)
    k_img, k_msk, k_attr, k_param = jax.random.split(key, 4)
    image = jax.random.normal(k_img, (B, C_in, Himg, Wimg), jnp.float32)
    mask = (jax.random.uniform(k_msk, (B, 1, Himg, Wimg)) > 0.5).astype(jnp.float32)
    masked_image = image * mask              # stand-in for the dataset's masked image
    attribute_tensor = jax.random.randint(k_attr, (B, seq), 0, vocab, jnp.int32)

    feat_hw = (Himg + 2 * 1 - 3) // 2 + 1    # 8
    params = init_params(
        k_param, in_channels=C_in, enc_channels=enc_channels, feat_hw=feat_hw,
        vocab=vocab, emb=emb_dim, enc_out=enc_out,
        image_embedding=image_embedding, cls_hidden=cls_hidden)

    fwd = jax.jit(masked_dale_forward)
    coords = fwd(params, image, attribute_tensor, masked_image)
    coords = jax.block_until_ready(coords)

    ref = reference_forward(params, image, attribute_tensor, masked_image)

    assert coords.shape == (B, 2)
    assert bool(jnp.all(jnp.isfinite(coords)))
    assert jnp.allclose(coords, ref, atol=1e-3, rtol=1e-3), (coords, ref)
    print("KERNEL_OK")
</pallas_src>

<mosaic_0001>
module attributes {stable_mosaic.version = 11 : i64} {
  func.func @_fused_kernel(%arg0: i32, %arg1: memref<72x128xf32, #tpu.memory_space<vmem>>, %arg2: memref<16x72xf32, #tpu.memory_space<vmem>>, %arg3: memref<16x1xf32, #tpu.memory_space<vmem>>, %arg4: memref<1024x16xf32, #tpu.memory_space<vmem>>, %arg5: memref<1x16xf32, #tpu.memory_space<vmem>>, %arg6: memref<16x32xf32, #tpu.memory_space<vmem>>, %arg7: memref<32x128xf32, #tpu.memory_space<vmem>>, %arg8: memref<32x128xf32, #tpu.memory_space<vmem>>, %arg9: memref<1x128xf32, #tpu.memory_space<vmem>>, %arg10: memref<16x64xf32, #tpu.memory_space<vmem>>, %arg11: memref<32x64xf32, #tpu.memory_space<vmem>>, %arg12: memref<1x64xf32, #tpu.memory_space<vmem>>, %arg13: memref<64x2xf32, #tpu.memory_space<vmem>>, %arg14: memref<1x2xf32, #tpu.memory_space<vmem>>, %arg15: memref<2x2xf32, #tpu.memory_space<vmem>>, %arg16: memref<2x1024xf32, #tpu.memory_space<vmem>>) attributes {dimension_semantics = [#tpu.dimension_semantics<arbitrary>], iteration_bounds = array<i64: 1>, scalar_prefetch = 0 : i64, scratch_operands = 1 : i64, tpu.core_type = #tpu.core_type<tc>, window_params = [{pipeline_mode = #tpu.pipeline_mode<synchronous>, transform_indices = @transform_0, window_bounds = array<i64: 72, 128>}, {pipeline_mode = #tpu.pipeline_mode<synchronous>, transform_indices = @transform_1, window_bounds = array<i64: 16, 72>}, {pipeline_mode = #tpu.pipeline_mode<synchronous>, transform_indices = @transform_2, window_bounds = array<i64: 16, 1>}, {pipeline_mode = #tpu.pipeline_mode<synchronous>, transform_indices = @transform_3, window_bounds = array<i64: 1024, 16>}, {pipeline_mode = #tpu.pipeline_mode<synchronous>, transform_indices = @transform_4, window_bounds = array<i64: 1, 16>}, {pipeline_mode = #tpu.pipeline_mode<synchronous>, transform_indices = @transform_5, window_bounds = array<i64: 16, 32>}, {pipeline_mode = #tpu.pipeline_mode<synchronous>, transform_indices = @transform_6, window_bounds = array<i64: 32, 128>}, {pipeline_mode = #tpu.pipeline_mode<synchronous>, transform_indices = @transform_7, window_bounds = array<i64: 32, 128>}, {pipeline_mode = #tpu.pipeline_mode<synchronous>, transform_indices = @transform_8, window_bounds = array<i64: 1, 128>}, {pipeline_mode = #tpu.pipeline_mode<synchronous>, transform_indices = @transform_9, window_bounds = array<i64: 16, 64>}, {pipeline_mode = #tpu.pipeline_mode<synchronous>, transform_indices = @transform_10, window_bounds = array<i64: 32, 64>}, {pipeline_mode = #tpu.pipeline_mode<synchronous>, transform_indices = @transform_11, window_bounds = array<i64: 1, 64>}, {pipeline_mode = #tpu.pipeline_mode<synchronous>, transform_indices = @transform_12, window_bounds = array<i64: 64, 2>}, {pipeline_mode = #tpu.pipeline_mode<synchronous>, transform_indices = @transform_13, window_bounds = array<i64: 1, 2>}, {pipeline_mode = #tpu.pipeline_mode<synchronous>, transform_indices = @transform_14, window_bounds = array<i64: 2, 2>}]} {
    %c0 = arith.constant 0 : index
    %c0_0 = arith.constant 0 : index
    %0 = vector.load %arg2[%c0, %c0_0] : memref<16x72xf32, #tpu.memory_space<vmem>>, vector<16x72xf32>
    %c0_1 = arith.constant 0 : index
    %c0_2 = arith.constant 0 : index
    %1 = vector.load %arg1[%c0_1, %c0_2] : memref<72x128xf32, #tpu.memory_space<vmem>>, vector<72x128xf32>
    %cst = arith.constant dense<0.000000e+00> : vector<16x128xf32>
    %2 = tpu.matmul %0, %1, %cst {dimension_numbers = #tpu.dot_dimension_numbers<[1], [0], [0], [1], [0, 0, 1, 1], [], []>} : vector<16x72xf32>, vector<72x128xf32>, vector<16x128xf32> -> vector<16x128xf32>
    %c0_3 = arith.constant 0 : index
    %c0_4 = arith.constant 0 : index
    %3 = vector.load %arg3[%c0_3, %c0_4] : memref<16x1xf32, #tpu.memory_space<vmem>>, vector<16x1xf32>
    %4 = vector.broadcast %3 : vector<16x1xf32> to vector<16x128xf32>
    %5 = arith.addf %2, %4 : vector<16x128xf32>
    %cst_5 = arith.constant 0.000000e+00 : f32
    %6 = vector.broadcast %cst_5 : f32 to vector<16x128xf32>
    %7 = arith.maximumf %5, %6 : vector<16x128xf32>
    %8 = vector.extract_strided_slice %7 {offsets = [0, 0], sizes = [1, 64], strides = [1, 1]} : vector<16x128xf32> to vector<1x64xf32>
    %c0_6 = arith.constant 0 : index
    %c0_7 = arith.constant 0 : index
    %9 = vector.load %arg16[%c0_6, %c0_7] : memref<2x1024xf32, #tpu.memory_space<vmem>>, vector<1x64xf32>
    tpu.vector_store %arg16[%c0_6, %c0_7], %8 {strides = array<i32>} : memref<2x1024xf32, #tpu.memory_space<vmem>>, vector<1x64xf32>,
    %10 = vector.extract_strided_slice %7 {offsets = [0, 64], sizes = [1, 64], strides = [1, 1]} : vector<16x128xf32> to vector<1x64xf32>
    %c1 = arith.constant 1 : index
    %c0_8 = arith.constant 0 : index
    %11 = vector.load %arg16[%c1, %c0_8] : memref<2x1024xf32, #tpu.memory_space<vmem>>, vector<1x64xf32>
    tpu.vector_store %arg16[%c1, %c0_8], %10 {strides = array<i32>} : memref<2x1024xf32, #tpu.memory_space<vmem>>, vector<1x64xf32>,
    %12 = vector.extract_strided_slice %7 {offsets = [1, 0], sizes = [1, 64], strides = [1, 1]} : vector<16x128xf32> to vector<1x64xf32>
    %c0_9 = arith.constant 0 : index
    %c64 = arith.constant 64 : index
    %13 = vector.load %arg16[%c0_9, %c64] : memref<2x1024xf32, #tpu.memory_space<vmem>>, vector<1x64xf32>
    tpu.vector_store %arg16[%c0_9, %c64], %12 {strides = array<i32>} : memref<2x1024xf32, #tpu.memory_space<vmem>>, vector<1x64xf32>,
    %14 = vector.extract_strided_slice %7 {offsets = [1, 64], sizes = [1, 64], strides = [1, 1]} : vector<16x128xf32> to vector<1x64xf32>
    %c1_10 = arith.constant 1 : index
    %c64_11 = arith.constant 64 : index
    %15 = vector.load %arg16[%c1_10, %c64_11] : memref<2x1024xf32, #tpu.memory_space<vmem>>, vector<1x64xf32>
    tpu.vector_store %arg16[%c1_10, %c64_11], %14 {strides = array<i32>} : memref<2x1024xf32, #tpu.memory_space<vmem>>, vector<1x64xf32>,
    %16 = vector.extract_strided_slice %7 {offsets = [2, 0], sizes = [1, 64], strides = [1, 1]} : vector<16x128xf32> to vector<1x64xf32>
    %c0_12 = arith.constant 0 : index
    %c128 = arith.constant 128 : index
    %17 = vector.load %arg16[%c0_12, %c128] : memref<2x1024xf32, #tpu.memory_space<vmem>>, vector<1x64xf32>
    tpu.vector_store %arg16[%c0_12, %c128], %16 {strides = array<i32>} : memref<2x1024xf32, #tpu.memory_space<vmem>>, vector<1x64xf32>,
    %18 = vector.extract_strided_slice %7 {offsets = [2, 64], sizes = [1, 64], strides = [1, 1]} : vector<16x128xf32> to vector<1x64xf32>
    %c1_13 = arith.constant 1 : index
    %c128_14 = arith.constant 128 : index
    %19 = vector.load %arg16[%c1_13, %c128_14] : memref<2x1024xf32, #tpu.memory_space<vmem>>, vector<1x64xf32>
    tpu.vector_store %arg16[%c1_13, %c128_14], %18 {strides = array<i32>} : memref<2x1024xf32, #tpu.memory_space<vmem>>, vector<1x64xf32>,
    %20 = vector.extract_strided_slice %7 {offsets = [3, 0], sizes = [1, 64], strides = [1, 1]} : vector<16x128xf32> to vector<1x64xf32>
    %c0_15 = arith.constant 0 : index
    %c192 = arith.constant 192 : index
    %21 = vector.load %arg16[%c0_15, %c192] : memref<2x1024xf32, #tpu.memory_space<vmem>>, vector<1x64xf32>
    tpu.vector_store %arg16[%c0_15, %c192], %20 {strides = array<i32>} : memref<2x1024xf32, #tpu.memory_space<vmem>>, vector<1x64xf32>,
    %22 = vector.extract_strided_slice %7 {offsets = [3, 64], sizes = [1, 64], strides = [1, 1]} : vector<16x128xf32> to vector<1x64xf32>
    %c1_16 = arith.constant 1 : index
    %c192_17 = arith.constant 192 : index
    %23 = vector.load %arg16[%c1_16, %c192_17] : memref<2x1024xf32, #tpu.memory_space<vmem>>, vector<1x64xf32>
    tpu.vector_store %arg16[%c1_16, %c192_17], %22 {strides = array<i32>} : memref<2x1024xf32, #tpu.memory_space<vmem>>, vector<1x64xf32>,
    %24 = vector.extract_strided_slice %7 {offsets = [4, 0], sizes = [1, 64], strides = [1, 1]} : vector<16x128xf32> to vector<1x64xf32>
    %c0_18 = arith.constant 0 : index
    %c256 = arith.constant 256 : index
    %25 = vector.load %arg16[%c0_18, %c256] : memref<2x1024xf32, #tpu.memory_space<vmem>>, vector<1x64xf32>
    tpu.vector_store %arg16[%c0_18, %c256], %24 {strides = array<i32>} : memref<2x1024xf32, #tpu.memory_space<vmem>>, vector<1x64xf32>,
    %26 = vector.extract_strided_slice %7 {offsets = [4, 64], sizes = [1, 64], strides = [1, 1]} : vector<16x128xf32> to vector<1x64xf32>
    %c1_19 = arith.constant 1 : index
    %c256_20 = arith.constant 256 : index
    %27 = vector.load %arg16[%c1_19, %c256_20] : memref<2x1024xf32, #tpu.memory_space<vmem>>, vector<1x64xf32>
    tpu.vector_store %arg16[%c1_19, %c256_20], %26 {strides = array<i32>} : memref<2x1024xf32, #tpu.memory_space<vmem>>, vector<1x64xf32>,
    %28 = vector.extract_strided_slice %7 {offsets = [5, 0], sizes = [1, 64], strides = [1, 1]} : vector<16x128xf32> to vector<1x64xf32>
    %c0_21 = arith.constant 0 : index
    %c320 = arith.constant 320 : index
    %29 = vector.load %arg16[%c0_21, %c320] : memref<2x1024xf32, #tpu.memory_space<vmem>>, vector<1x64xf32>
    tpu.vector_store %arg16[%c0_21, %c320], %28 {strides = array<i32>} : memref<2x1024xf32, #tpu.memory_space<vmem>>, vector<1x64xf32>,
    %30 = vector.extract_strided_slice %7 {offsets = [5, 64], sizes = [1, 64], strides = [1, 1]} : vector<16x128xf32> to vector<1x64xf32>
    %c1_22 = arith.constant 1 : index
    %c320_23 = arith.constant 320 : index
    %31 = vector.load %arg16[%c1_22, %c320_23] : memref<2x1024xf32, #tpu.memory_space<vmem>>, vector<1x64xf32>
    tpu.vector_store %arg16[%c1_22, %c320_23], %30 {strides = array<i32>} : memref<2x1024xf32, #tpu.memory_space<vmem>>, vector<1x64xf32>,
    %32 = vector.extract_strided_slice %7 {offsets = [6, 0], sizes = [1, 64], strides = [1, 1]} : vector<16x128xf32> to vector<1x64xf32>
    %c0_24 = arith.constant 0 : index
    %c384 = arith.constant 384 : index
    %33 = vector.load %arg16[%c0_24, %c384] : memref<2x1024xf32, #tpu.memory_space<vmem>>, vector<1x64xf32>
    tpu.vector_store %arg16[%c0_24, %c384], %32 {strides = array<i32>} : memref<2x1024xf32, #tpu.memory_space<vmem>>, vector<1x64xf32>,
    %34 = vector.extract_strided_slice %7 {offsets = [6, 64], sizes = [1, 64], strides = [1, 1]} : vector<16x128xf32> to vector<1x64xf32>
    %c1_25 = arith.constant 1 : index
    %c384_26 = arith.constant 384 : index
    %35 = vector.load %arg16[%c1_25, %c384_26] : memref<2x1024xf32, #tpu.memory_space<vmem>>, vector<1x64xf32>
    tpu.vector_store %arg16[%c1_25, %c384_26], %34 {strides = array<i32>} : memref<2x1024xf32, #tpu.memory_space<vmem>>, vector<1x64xf32>,
    %36 = vector.extract_strided_slice %7 {offsets = [7, 0], sizes = [1, 64], strides = [1, 1]} : vector<16x128xf32> to vector<1x64xf32>
    %c0_27 = arith.constant 0 : index
    %c448 = arith.constant 448 : index
    %37 = vector.load %arg16[%c0_27, %c448] : memref<2x1024xf32, #tpu.memory_space<vmem>>, vector<1x64xf32>
    tpu.vector_store %arg16[%c0_27, %c448], %36 {strides = array<i32>} : memref<2x1024xf32, #tpu.memory_space<vmem>>, vector<1x64xf32>,
    %38 = vector.extract_strided_slice %7 {offsets = [7, 64], sizes = [1, 64], strides = [1, 1]} : vector<16x128xf32> to vector<1x64xf32>
    %c1_28 = arith.constant 1 : index
    %c448_29 = arith.constant 448 : index
    %39 = vector.load %arg16[%c1_28, %c448_29] : memref<2x1024xf32, #tpu.memory_space<vmem>>, vector<1x64xf32>
    tpu.vector_store %arg16[%c1_28, %c448_29], %38 {strides = array<i32>} : memref<2x1024xf32, #tpu.memory_space<vmem>>, vector<1x64xf32>,
    %40 = vector.extract_strided_slice %7 {offsets = [8, 0], sizes = [1, 64], strides = [1, 1]} : vector<16x128xf32> to vector<1x64xf32>
    %c0_30 = arith.constant 0 : index
    %c512 = arith.constant 512 : index
    %41 = vector.load %arg16[%c0_30, %c512] : memref<2x1024xf32, #tpu.memory_space<vmem>>, vector<1x64xf32>
    tpu.vector_store %arg16[%c0_30, %c512], %40 {strides = array<i32>} : memref<2x1024xf32, #tpu.memory_space<vmem>>, vector<1x64xf32>,
    %42 = vector.extract_strided_slice %7 {offsets = [8, 64], sizes = [1, 64], strides = [1, 1]} : vector<16x128xf32> to vector<1x64xf32>
    %c1_31 = arith.constant 1 : index
    %c512_32 = arith.constant 512 : index
    %43 = vector.load %arg16[%c1_31, %c512_32] : memref<2x1024xf32, #tpu.memory_space<vmem>>, vector<1x64xf32>
    tpu.vector_store %arg16[%c1_31, %c512_32], %42 {strides = array<i32>} : memref<2x1024xf32, #tpu.memory_space<vmem>>, vector<1x64xf32>,
    %44 = vector.extract_strided_slice %7 {offsets = [9, 0], sizes = [1, 64], strides = [1, 1]} : vector<16x128xf32> to vector<1x64xf32>
    %c0_33 = arith.constant 0 : index
    %c576 = arith.constant 576 : index
    %45 = vector.load %arg16[%c0_33, %c576] : memref<2x1024xf32, #tpu.memory_space<vmem>>, vector<1x64xf32>
    tpu.vector_store %arg16[%c0_33, %c576], %44 {strides = array<i32>} : memref<2x1024xf32, #tpu.memory_space<vmem>>, vector<1x64xf32>,
    %46 = vector.extract_strided_slice %7 {offsets = [9, 64], sizes = [1, 64], strides = [1, 1]} : vector<16x128xf32> to vector<1x64xf32>
    %c1_34 = arith.constant 1 : index
    %c576_35 = arith.constant 576 : index
    %47 = vector.load %arg16[%c1_34, %c576_35] : memref<2x1024xf32, #tpu.memory_space<vmem>>, vector<1x64xf32>
    tpu.vector_store %arg16[%c1_34, %c576_35], %46 {strides = array<i32>} : memref<2x1024xf32, #tpu.memory_space<vmem>>, vector<1x64xf32>,
    %48 = vector.extract_strided_slice %7 {offsets = [10, 0], sizes = [1, 64], strides = [1, 1]} : vector<16x128xf32> to vector<1x64xf32>
    %c0_36 = arith.constant 0 : index
    %c640 = arith.constant 640 : index
    %49 = vector.load %arg16[%c0_36, %c640] : memref<2x1024xf32, #tpu.memory_space<vmem>>, vector<1x64xf32>
    tpu.vector_store %arg16[%c0_36, %c640], %48 {strides = array<i32>} : memref<2x1024xf32, #tpu.memory_space<vmem>>, vector<1x64xf32>,
    %50 = vector.extract_strided_slice %7 {offsets = [10, 64], sizes = [1, 64], strides = [1, 1]} : vector<16x128xf32> to vector<1x64xf32>
    %c1_37 = arith.constant 1 : index
    %c640_38 = arith.constant 640 : index
    %51 = vector.load %arg16[%c1_37, %c640_38] : memref<2x1024xf32, #tpu.memory_space<vmem>>, vector<1x64xf32>
    tpu.vector_store %arg16[%c1_37, %c640_38], %50 {strides = array<i32>} : memref<2x1024xf32, #tpu.memory_space<vmem>>, vector<1x64xf32>,
    %52 = vector.extract_strided_slice %7 {offsets = [11, 0], sizes = [1, 64], strides = [1, 1]} : vector<16x128xf32> to vector<1x64xf32>
    %c0_39 = arith.constant 0 : index
    %c704 = arith.constant 704 : index
    %53 = vector.load %arg16[%c0_39, %c704] : memref<2x1024xf32, #tpu.memory_space<vmem>>, vector<1x64xf32>
    tpu.vector_store %arg16[%c0_39, %c704], %52 {strides = array<i32>} : memref<2x1024xf32, #tpu.memory_space<vmem>>, vector<1x64xf32>,
    %54 = vector.extract_strided_slice %7 {offsets = [11, 64], sizes = [1, 64], strides = [1, 1]} : vector<16x128xf32> to vector<1x64xf32>
    %c1_40 = arith.constant 1 : index
    %c704_41 = arith.constant 704 : index
    %55 = vector.load %arg16[%c1_40, %c704_41] : memref<2x1024xf32, #tpu.memory_space<vmem>>, vector<1x64xf32>
    tpu.vector_store %arg16[%c1_40, %c704_41], %54 {strides = array<i32>} : memref<2x1024xf32, #tpu.memory_space<vmem>>, vector<1x64xf32>,
    %56 = vector.extract_strided_slice %7 {offsets = [12, 0], sizes = [1, 64], strides = [1, 1]} : vector<16x128xf32> to vector<1x64xf32>
    %c0_42 = arith.constant 0 : index
    %c768 = arith.constant 768 : index
    %57 = vector.load %arg16[%c0_42, %c768] : memref<2x1024xf32, #tpu.memory_space<vmem>>, vector<1x64xf32>
    tpu.vector_store %arg16[%c0_42, %c768], %56 {strides = array<i32>} : memref<2x1024xf32, #tpu.memory_space<vmem>>, vector<1x64xf32>,
    %58 = vector.extract_strided_slice %7 {offsets = [12, 64], sizes = [1, 64], strides = [1, 1]} : vector<16x128xf32> to vector<1x64xf32>
    %c1_43 = arith.constant 1 : index
    %c768_44 = arith.constant 768 : index
    %59 = vector.load %arg16[%c1_43, %c768_44] : memref<2x1024xf32, #tpu.memory_space<vmem>>, vector<1x64xf32>
    tpu.vector_store %arg16[%c1_43, %c768_44], %58 {strides = array<i32>} : memref<2x1024xf32, #tpu.memory_space<vmem>>, vector<1x64xf32>,
    %60 = vector.extract_strided_slice %7 {offsets = [13, 0], sizes = [1, 64], strides = [1, 1]} : vector<16x128xf32> to vector<1x64xf32>
    %c0_45 = arith.constant 0 : index
    %c832 = arith.constant 832 : index
    %61 = vector.load %arg16[%c0_45, %c832] : memref<2x1024xf32, #tpu.memory_space<vmem>>, vector<1x64xf32>
    tpu.vector_store %arg16[%c0_45, %c832], %60 {strides = array<i32>} : memref<2x1024xf32, #tpu.memory_space<vmem>>, vector<1x64xf32>,
    %62 = vector.extract_strided_slice %7 {offsets = [13, 64], sizes = [1, 64], strides = [1, 1]} : vector<16x128xf32> to vector<1x64xf32>
    %c1_46 = arith.constant 1 : index
    %c832_47 = arith.constant 832 : index
    %63 = vector.load %arg16[%c1_46, %c832_47] : memref<2x1024xf32, #tpu.memory_space<vmem>>, vector<1x64xf32>
    tpu.vector_store %arg16[%c1_46, %c832_47], %62 {strides = array<i32>} : memref<2x1024xf32, #tpu.memory_space<vmem>>, vector<1x64xf32>,
    %64 = vector.extract_strided_slice %7 {offsets = [14, 0], sizes = [1, 64], strides = [1, 1]} : vector<16x128xf32> to vector<1x64xf32>
    %c0_48 = arith.constant 0 : index
    %c896 = arith.constant 896 : index
    %65 = vector.load %arg16[%c0_48, %c896] : memref<2x1024xf32, #tpu.memory_space<vmem>>, vector<1x64xf32>
    tpu.vector_store %arg16[%c0_48, %c896], %64 {strides = array<i32>} : memref<2x1024xf32, #tpu.memory_space<vmem>>, vector<1x64xf32>,
    %66 = vector.extract_strided_slice %7 {offsets = [14, 64], sizes = [1, 64], strides = [1, 1]} : vector<16x128xf32> to vector<1x64xf32>
    %c1_49 = arith.constant 1 : index
    %c896_50 = arith.constant 896 : index
    %67 = vector.load %arg16[%c1_49, %c896_50] : memref<2x1024xf32, #tpu.memory_space<vmem>>, vector<1x64xf32>
    tpu.vector_store %arg16[%c1_49, %c896_50], %66 {strides = array<i32>} : memref<2x1024xf32, #tpu.memory_space<vmem>>, vector<1x64xf32>,
    %68 = vector.extract_strided_slice %7 {offsets = [15, 0], sizes = [1, 64], strides = [1, 1]} : vector<16x128xf32> to vector<1x64xf32>
    %c0_51 = arith.constant 0 : index
    %c960 = arith.constant 960 : index
    %69 = vector.load %arg16[%c0_51, %c960] : memref<2x1024xf32, #tpu.memory_space<vmem>>, vector<1x64xf32>
    tpu.vector_store %arg16[%c0_51, %c960], %68 {strides = array<i32>} : memref<2x1024xf32, #tpu.memory_space<vmem>>, vector<1x64xf32>,
    %70 = vector.extract_strided_slice %7 {offsets = [15, 64], sizes = [1, 64], strides = [1, 1]} : vector<16x128xf32> to vector<1x64xf32>
    %c1_52 = arith.constant 1 : index
    %c960_53 = arith.constant 960 : index
    %71 = vector.load %arg16[%c1_52, %c960_53] : memref<2x1024xf32, #tpu.memory_space<vmem>>, vector<1x64xf32>
    tpu.vector_store %arg16[%c1_52, %c960_53], %70 {strides = array<i32>} : memref<2x1024xf32, #tpu.memory_space<vmem>>, vector<1x64xf32>,
    %c0_54 = arith.constant 0 : index
    %c0_55 = arith.constant 0 : index
    %72 = vector.load %arg16[%c0_54, %c0_55] : memref<2x1024xf32, #tpu.memory_space<vmem>>, vector<2x1024xf32>
    %c0_56 = arith.constant 0 : index
    %c0_57 = arith.constant 0 : index
    %73 = vector.load %arg4[%c0_56, %c0_57] : memref<1024x16xf32, #tpu.memory_space<vmem>>, vector<1024x16xf32>
    %cst_58 = arith.constant dense<0.000000e+00> : vector<2x16xf32>
    %74 = tpu.matmul %72, %73, %cst_58 {dimension_numbers = #tpu.dot_dimension_numbers<[1], [0], [0], [1], [0, 0, 1, 1], [], []>} : vector<2x1024xf32>, vector<1024x16xf32>, vector<2x16xf32> -> vector<2x16xf32>
    %c0_59 = arith.constant 0 : index
    %c0_60 = arith.constant 0 : index
    %75 = vector.load %arg5[%c0_59, %c0_60] : memref<1x16xf32, #tpu.memory_space<vmem>>, vector<1x16xf32>
    %76 = vector.broadcast %75 : vector<1x16xf32> to vector<2x16xf32>
    %77 = arith.addf %74, %76 : vector<2x16xf32>
    %c0_61 = arith.constant 0 : index
    %c0_62 = arith.constant 0 : index
    %78 = vector.load %arg6[%c0_61, %c0_62] : memref<16x32xf32, #tpu.memory_space<vmem>>, vector<16x32xf32>
    %c0_63 = arith.constant 0 : index
    %c0_64 = arith.constant 0 : index
    %79 = vector.load %arg7[%c0_63, %c0_64] : memref<32x128xf32, #tpu.memory_space<vmem>>, vector<32x128xf32>
    %cst_65 = arith.constant dense<0.000000e+00> : vector<16x128xf32>
    %80 = tpu.matmul %78, %79, %cst_65 {dimension_numbers = #tpu.dot_dimension_numbers<[1], [0], [0], [1], [0, 0, 1, 1], [], []>} : vector<16x32xf32>, vector<32x128xf32>, vector<16x128xf32> -> vector<16x128xf32>
    %c0_66 = arith.constant 0 : index
    %c0_67 = arith.constant 0 : index
    %81 = vector.load %arg9[%c0_66, %c0_67] : memref<1x128xf32, #tpu.memory_space<vmem>>, vector<1x128xf32>
    %82 = vector.broadcast %81 : vector<1x128xf32> to vector<16x128xf32>
    %83 = arith.addf %80, %82 : vector<16x128xf32>
    %c0_68 = arith.constant 0 : index
    %c0_69 = arith.constant 0 : index
    %84 = vector.load %arg8[%c0_68, %c0_69] : memref<32x128xf32, #tpu.memory_space<vmem>>, vector<32x128xf32>
    %cst_70 = arith.constant 0.000000e+00 : f32
    %85 = vector.broadcast %cst_70 : f32 to vector<2x32xf32>
    %cst_71 = arith.constant 0.000000e+00 : f32
    %86 = vector.broadcast %cst_71 : f32 to vector<2x32xf32>
    %87 = vector.extract_strided_slice %83 {offsets = [0, 0], sizes = [2, 128], strides = [1, 1]} : vector<16x128xf32> to vector<2x128xf32>
    %cst_72 = arith.constant dense<0.000000e+00> : vector<2x128xf32>
    %88 = tpu.matmul %85, %84, %cst_72 {dimension_numbers = #tpu.dot_dimension_numbers<[1], [0], [0], [1], [0, 0, 1, 1], [], []>} : vector<2x32xf32>, vector<32x128xf32>, vector<2x128xf32> -> vector<2x128xf32>
    %89 = arith.addf %87, %88 : vector<2x128xf32>
    %90 = arith.negf %89 : vector<2x128xf32>
    %91 = math.exp %90 : vector<2x128xf32>
    %cst_73 = arith.constant 1.000000e+00 : f32
    %92 = vector.broadcast %cst_73 : f32 to vector<2x128xf32>
    %93 = arith.addf %92, %91 : vector<2x128xf32>
    %94 = arith.divf %92, %93 : vector<2x128xf32>
    %95 = vector.extract_strided_slice %94 {offsets = [0, 0], sizes = [2, 32], strides = [1, 1]} : vector<2x128xf32> to vector<2x32xf32>
    %96 = vector.extract_strided_slice %94 {offsets = [0, 32], sizes = [2, 32], strides = [1, 1]} : vector<2x128xf32> to vector<2x32xf32>
    %97 = vector.extract_strided_slice %94 {offsets = [0, 96], sizes = [2, 32], strides = [1, 1]} : vector<2x128xf32> to vector<2x32xf32>
    %98 = vector.extract_strided_slice %89 {offsets = [0, 64], sizes = [2, 32], strides = [1, 1]} : vector<2x128xf32> to vector<2x32xf32>
    %99 = math.tanh %98 : vector<2x32xf32>
    %100 = arith.mulf %96, %86 : vector<2x32xf32>
    %101 = arith.mulf %95, %99 : vector<2x32xf32>
    %102 = arith.addf %100, %101 : vector<2x32xf32>
    %103 = math.tanh %102 : vector<2x32xf32>
    %104 = arith.mulf %97, %103 : vector<2x32xf32>
    %105 = vector.extract_strided_slice %83 {offsets = [2, 0], sizes = [2, 128], strides = [1, 1]} : vector<16x128xf32> to vector<2x128xf32>
    %cst_74 = arith.constant dense<0.000000e+00> : vector<2x128xf32>
    %106 = tpu.matmul %104, %84, %cst_74 {dimension_numbers = #tpu.dot_dimension_numbers<[1], [0], [0], [1], [0, 0, 1, 1], [], []>} : vector<2x32xf32>, vector<32x128xf32>, vector<2x128xf32> -> vector<2x128xf32>
    %107 = arith.addf %105, %106 : vector<2x128xf32>
    %108 = arith.negf %107 : vector<2x128xf32>
    %109 = math.exp %108 : vector<2x128xf32>
    %cst_75 = arith.constant 1.000000e+00 : f32
    %110 = vector.broadcast %cst_75 : f32 to vector<2x128xf32>
    %111 = arith.addf %110, %109 : vector<2x128xf32>
    %112 = arith.divf %110, %111 : vector<2x128xf32>
    %113 = vector.extract_strided_slice %112 {offsets = [0, 0], sizes = [2, 32], strides = [1, 1]} : vector<2x128xf32> to vector<2x32xf32>
    %114 = vector.extract_strided_slice %112 {offsets = [0, 32], sizes = [2, 32], strides = [1, 1]} : vector<2x128xf32> to vector<2x32xf32>
    %115 = vector.extract_strided_slice %112 {offsets = [0, 96], sizes = [2, 32], strides = [1, 1]} : vector<2x128xf32> to vector<2x32xf32>
    %116 = vector.extract_strided_slice %107 {offsets = [0, 64], sizes = [2, 32], strides = [1, 1]} : vector<2x128xf32> to vector<2x32xf32>
    %117 = math.tanh %116 : vector<2x32xf32>
    %118 = arith.mulf %114, %102 : vector<2x32xf32>
    %119 = arith.mulf %113, %117 : vector<2x32xf32>
    %120 = arith.addf %118, %119 : vector<2x32xf32>
    %121 = math.tanh %120 : vector<2x32xf32>
    %122 = arith.mulf %115, %121 : vector<2x32xf32>
    %123 = vector.extract_strided_slice %83 {offsets = [4, 0], sizes = [2, 128], strides = [1, 1]} : vector<16x128xf32> to vector<2x128xf32>
    %cst_76 = arith.constant dense<0.000000e+00> : vector<2x128xf32>
    %124 = tpu.matmul %122, %84, %cst_76 {dimension_numbers = #tpu.dot_dimension_numbers<[1], [0], [0], [1], [0, 0, 1, 1], [], []>} : vector<2x32xf32>, vector<32x128xf32>, vector<2x128xf32> -> vector<2x128xf32>
    %125 = arith.addf %123, %124 : vector<2x128xf32>
    %126 = arith.negf %125 : vector<2x128xf32>
    %127 = math.exp %126 : vector<2x128xf32>
    %cst_77 = arith.constant 1.000000e+00 : f32
    %128 = vector.broadcast %cst_77 : f32 to vector<2x128xf32>
    %129 = arith.addf %128, %127 : vector<2x128xf32>
    %130 = arith.divf %128, %129 : vector<2x128xf32>
    %131 = vector.extract_strided_slice %130 {offsets = [0, 0], sizes = [2, 32], strides = [1, 1]} : vector<2x128xf32> to vector<2x32xf32>
    %132 = vector.extract_strided_slice %130 {offsets = [0, 32], sizes = [2, 32], strides = [1, 1]} : vector<2x128xf32> to vector<2x32xf32>
    %133 = vector.extract_strided_slice %130 {offsets = [0, 96], sizes = [2, 32], strides = [1, 1]} : vector<2x128xf32> to vector<2x32xf32>
    %134 = vector.extract_strided_slice %125 {offsets = [0, 64], sizes = [2, 32], strides = [1, 1]} : vector<2x128xf32> to vector<2x32xf32>
    %135 = math.tanh %134 : vector<2x32xf32>
    %136 = arith.mulf %132, %120 : vector<2x32xf32>
    %137 = arith.mulf %131, %135 : vector<2x32xf32>
    %138 = arith.addf %136, %137 : vector<2x32xf32>
    %139 = math.tanh %138 : vector<2x32xf32>
    %140 = arith.mulf %133, %139 : vector<2x32xf32>
    %141 = vector.extract_strided_slice %83 {offsets = [6, 0], sizes = [2, 128], strides = [1, 1]} : vector<16x128xf32> to vector<2x128xf32>
    %cst_78 = arith.constant dense<0.000000e+00> : vector<2x128xf32>
    %142 = tpu.matmul %140, %84, %cst_78 {dimension_numbers = #tpu.dot_dimension_numbers<[1], [0], [0], [1], [0, 0, 1, 1], [], []>} : vector<2x32xf32>, vector<32x128xf32>, vector<2x128xf32> -> vector<2x128xf32>
    %143 = arith.addf %141, %142 : vector<2x128xf32>
    %144 = arith.negf %143 : vector<2x128xf32>
    %145 = math.exp %144 : vector<2x128xf32>
    %cst_79 = arith.constant 1.000000e+00 : f32
    %146 = vector.broadcast %cst_79 : f32 to vector<2x128xf32>
    %147 = arith.addf %146, %145 : vector<2x128xf32>
    %148 = arith.divf %146, %147 : vector<2x128xf32>
    %149 = vector.extract_strided_slice %148 {offsets = [0, 0], sizes = [2, 32], strides = [1, 1]} : vector<2x128xf32> to vector<2x32xf32>
    %150 = vector.extract_strided_slice %148 {offsets = [0, 32], sizes = [2, 32], strides = [1, 1]} : vector<2x128xf32> to vector<2x32xf32>
    %151 = vector.extract_strided_slice %148 {offsets = [0, 96], sizes = [2, 32], strides = [1, 1]} : vector<2x128xf32> to vector<2x32xf32>
    %152 = vector.extract_strided_slice %143 {offsets = [0, 64], sizes = [2, 32], strides = [1, 1]} : vector<2x128xf32> to vector<2x32xf32>
    %153 = math.tanh %152 : vector<2x32xf32>
    %154 = arith.mulf %150, %138 : vector<2x32xf32>
    %155 = arith.mulf %149, %153 : vector<2x32xf32>
    %156 = arith.addf %154, %155 : vector<2x32xf32>
    %157 = math.tanh %156 : vector<2x32xf32>
    %158 = arith.mulf %151, %157 : vector<2x32xf32>
    %159 = vector.extract_strided_slice %83 {offsets = [8, 0], sizes = [2, 128], strides = [1, 1]} : vector<16x128xf32> to vector<2x128xf32>
    %cst_80 = arith.constant dense<0.000000e+00> : vector<2x128xf32>
    %160 = tpu.matmul %158, %84, %cst_80 {dimension_numbers = #tpu.dot_dimension_numbers<[1], [0], [0], [1], [0, 0, 1, 1], [], []>} : vector<2x32xf32>, vector<32x128xf32>, vector<2x128xf32> -> vector<2x128xf32>
    %161 = arith.addf %159, %160 : vector<2x128xf32>
    %162 = arith.negf %161 : vector<2x128xf32>
    %163 = math.exp %162 : vector<2x128xf32>
    %cst_81 = arith.constant 1.000000e+00 : f32
    %164 = vector.broadcast %cst_81 : f32 to vector<2x128xf32>
    %165 = arith.addf %164, %163 : vector<2x128xf32>
    %166 = arith.divf %164, %165 : vector<2x128xf32>
    %167 = vector.extract_strided_slice %166 {offsets = [0, 0], sizes = [2, 32], strides = [1, 1]} : vector<2x128xf32> to vector<2x32xf32>
    %168 = vector.extract_strided_slice %166 {offsets = [0, 32], sizes = [2, 32], strides = [1, 1]} : vector<2x128xf32> to vector<2x32xf32>
    %169 = vector.extract_strided_slice %166 {offsets = [0, 96], sizes = [2, 32], strides = [1, 1]} : vector<2x128xf32> to vector<2x32xf32>
    %170 = vector.extract_strided_slice %161 {offsets = [0, 64], sizes = [2, 32], strides = [1, 1]} : vector<2x128xf32> to vector<2x32xf32>
    %171 = math.tanh %170 : vector<2x32xf32>
    %172 = arith.mulf %168, %156 : vector<2x32xf32>
    %173 = arith.mulf %167, %171 : vector<2x32xf32>
    %174 = arith.addf %172, %173 : vector<2x32xf32>
    %175 = math.tanh %174 : vector<2x32xf32>
    %176 = arith.mulf %169, %175 : vector<2x32xf32>
    %177 = vector.extract_strided_slice %83 {offsets = [10, 0], sizes = [2, 128], strides = [1, 1]} : vector<16x128xf32> to vector<2x128xf32>
    %cst_82 = arith.constant dense<0.000000e+00> : vector<2x128xf32>
    %178 = tpu.matmul %176, %84, %cst_82 {dimension_numbers = #tpu.dot_dimension_numbers<[1], [0], [0], [1], [0, 0, 1, 1], [], []>} : vector<2x32xf32>, vector<32x128xf32>, vector<2x128xf32> -> vector<2x128xf32>
    %179 = arith.addf %177, %178 : vector<2x128xf32>
    %180 = arith.negf %179 : vector<2x128xf32>
    %181 = math.exp %180 : vector<2x128xf32>
    %cst_83 = arith.constant 1.000000e+00 : f32
    %182 = vector.broadcast %cst_83 : f32 to vector<2x128xf32>
    %183 = arith.addf %182, %181 : vector<2x128xf32>
    %184 = arith.divf %182, %183 : vector<2x128xf32>
    %185 = vector.extract_strided_slice %184 {offsets = [0, 0], sizes = [2, 32], strides = [1, 1]} : vector<2x128xf32> to vector<2x32xf32>
    %186 = vector.extract_strided_slice %184 {offsets = [0, 32], sizes = [2, 32], strides = [1, 1]} : vector<2x128xf32> to vector<2x32xf32>
    %187 = vector.extract_strided_slice %184 {offsets = [0, 96], sizes = [2, 32], strides = [1, 1]} : vector<2x128xf32> to vector<2x32xf32>
    %188 = vector.extract_strided_slice %179 {offsets = [0, 64], sizes = [2, 32], strides = [1, 1]} : vector<2x128xf32> to vector<2x32xf32>
    %189 = math.tanh %188 : vector<2x32xf32>
    %190 = arith.mulf %186, %174 : vector<2x32xf32>
    %191 = arith.mulf %185, %189 : vector<2x32xf32>
    %192 = arith.addf %190, %191 : vector<2x32xf32>
    %193 = math.tanh %192 : vector<2x32xf32>
    %194 = arith.mulf %187, %193 : vector<2x32xf32>
    %195 = vector.extract_strided_slice %83 {offsets = [12, 0], sizes = [2, 128], strides = [1, 1]} : vector<16x128xf32> to vector<2x128xf32>
    %cst_84 = arith.constant dense<0.000000e+00> : vector<2x128xf32>
    %196 = tpu.matmul %194, %84, %cst_84 {dimension_numbers = #tpu.dot_dimension_numbers<[1], [0], [0], [1], [0, 0, 1, 1], [], []>} : vector<2x32xf32>, vector<32x128xf32>, vector<2x128xf32> -> vector<2x128xf32>
    %197 = arith.addf %195, %196 : vector<2x128xf32>
    %198 = arith.negf %197 : vector<2x128xf32>
    %199 = math.exp %198 : vector<2x128xf32>
    %cst_85 = arith.constant 1.000000e+00 : f32
    %200 = vector.broadcast %cst_85 : f32 to vector<2x128xf32>
    %201 = arith.addf %200, %199 : vector<2x128xf32>
    %202 = arith.divf %200, %201 : vector<2x128xf32>
    %203 = vector.extract_strided_slice %202 {offsets = [0, 0], sizes = [2, 32], strides = [1, 1]} : vector<2x128xf32> to vector<2x32xf32>
    %204 = vector.extract_strided_slice %202 {offsets = [0, 32], sizes = [2, 32], strides = [1, 1]} : vector<2x128xf32> to vector<2x32xf32>
    %205 = vector.extract_strided_slice %202 {offsets = [0, 96], sizes = [2, 32], strides = [1, 1]} : vector<2x128xf32> to vector<2x32xf32>
    %206 = vector.extract_strided_slice %197 {offsets = [0, 64], sizes = [2, 32], strides = [1, 1]} : vector<2x128xf32> to vector<2x32xf32>
    %207 = math.tanh %206 : vector<2x32xf32>
    %208 = arith.mulf %204, %192 : vector<2x32xf32>
    %209 = arith.mulf %203, %207 : vector<2x32xf32>
    %210 = arith.addf %208, %209 : vector<2x32xf32>
    %211 = math.tanh %210 : vector<2x32xf32>
    %212 = arith.mulf %205, %211 : vector<2x32xf32>
    %213 = vector.extract_strided_slice %83 {offsets = [14, 0], sizes = [2, 128], strides = [1, 1]} : vector<16x128xf32> to vector<2x128xf32>
    %cst_86 = arith.constant dense<0.000000e+00> : vector<2x128xf32>
    %214 = tpu.matmul %212, %84, %cst_86 {dimension_numbers = #tpu.dot_dimension_numbers<[1], [0], [0], [1], [0, 0, 1, 1], [], []>} : vector<2x32xf32>, vector<32x128xf32>, vector<2x128xf32> -> vector<2x128xf32>
    %215 = arith.addf %213, %214 : vector<2x128xf32>
    %216 = arith.negf %215 : vector<2x128xf32>
    %217 = math.exp %216 : vector<2x128xf32>
    %cst_87 = arith.constant 1.000000e+00 : f32
    %218 = vector.broadcast %cst_87 : f32 to vector<2x128xf32>
    %219 = arith.addf %218, %217 : vector<2x128xf32>
    %220 = arith.divf %218, %219 : vector<2x128xf32>
    %221 = vector.extract_strided_slice %220 {offsets = [0, 0], sizes = [2, 32], strides = [1, 1]} : vector<2x128xf32> to vector<2x32xf32>
    %222 = vector.extract_strided_slice %220 {offsets = [0, 32], sizes = [2, 32], strides = [1, 1]} : vector<2x128xf32> to vector<2x32xf32>
    %223 = vector.extract_strided_slice %220 {offsets = [0, 96], sizes = [2, 32], strides = [1, 1]} : vector<2x128xf32> to vector<2x32xf32>
    %224 = vector.extract_strided_slice %215 {offsets = [0, 64], sizes = [2, 32], strides = [1, 1]} : vector<2x128xf32> to vector<2x32xf32>
    %225 = math.tanh %224 : vector<2x32xf32>
    %226 = arith.mulf %222, %210 : vector<2x32xf32>
    %227 = arith.mulf %221, %225 : vector<2x32xf32>
    %228 = arith.addf %226, %227 : vector<2x32xf32>
    %229 = math.tanh %228 : vector<2x32xf32>
    %230 = arith.mulf %223, %229 : vector<2x32xf32>
    %c0_88 = arith.constant 0 : index
    %c0_89 = arith.constant 0 : index
    %231 = vector.load %arg10[%c0_88, %c0_89] : memref<16x64xf32, #tpu.memory_space<vmem>>, vector<16x64xf32>
    %cst_90 = arith.constant dense<0.000000e+00> : vector<2x64xf32>
    %232 = tpu.matmul %77, %231, %cst_90 {dimension_numbers = #tpu.dot_dimension_numbers<[1], [0], [0], [1], [0, 0, 1, 1], [], []>} : vector<2x16xf32>, vector<16x64xf32>, vector<2x64xf32> -> vector<2x64xf32>
    %c0_91 = arith.constant 0 : index
    %c0_92 = arith.constant 0 : index
    %233 = vector.load %arg11[%c0_91, %c0_92] : memref<32x64xf32, #tpu.memory_space<vmem>>, vector<32x64xf32>
    %cst_93 = arith.constant dense<0.000000e+00> : vector<2x64xf32>
    %234 = tpu.matmul %230, %233, %cst_93 {dimension_numbers = #tpu.dot_dimension_numbers<[1], [0], [0], [1], [0, 0, 1, 1], [], []>} : vector<2x32xf32>, vector<32x64xf32>, vector<2x64xf32> -> vector<2x64xf32>
    %235 = arith.addf %232, %234 : vector<2x64xf32>
    %c0_94 = arith.constant 0 : index
    %c0_95 = arith.constant 0 : index
    %236 = vector.load %arg12[%c0_94, %c0_95] : memref<1x64xf32, #tpu.memory_space<vmem>>, vector<1x64xf32>
    %237 = vector.broadcast %236 : vector<1x64xf32> to vector<2x64xf32>
    %238 = arith.addf %235, %237 : vector<2x64xf32>
    %cst_96 = arith.constant 0.000000e+00 : f32
    %239 = vector.broadcast %cst_96 : f32 to vector<2x64xf32>
    %240 = arith.maximumf %238, %239 : vector<2x64xf32>
    %c0_97 = arith.constant 0 : index
    %c0_98 = arith.constant 0 : index
    %241 = vector.load %arg13[%c0_97, %c0_98] : memref<64x2xf32, #tpu.memory_space<vmem>>, vector<64x2xf32>
    %cst_99 = arith.constant dense<0.000000e+00> : vector<2x2xf32>
    %242 = tpu.matmul %240, %241, %cst_99 {dimension_numbers = #tpu.dot_dimension_numbers<[1], [0], [0], [1], [0, 0, 1, 1], [], []>} : vector<2x64xf32>, vector<64x2xf32>, vector<2x2xf32> -> vector<2x2xf32>
    %c0_100 = arith.constant 0 : index
    %c0_101 = arith.constant 0 : index
    %243 = vector.load %arg14[%c0_100, %c0_101] : memref<1x2xf32, #tpu.memory_space<vmem>>, vector<1x2xf32>
    %244 = vector.broadcast %243 : vector<1x2xf32> to vector<2x2xf32>
    %245 = arith.addf %242, %244 : vector<2x2xf32>
    %c0_102 = arith.constant 0 : index
    %c0_103 = arith.constant 0 : index
    %246 = vector.load %arg15[%c0_102, %c0_103] : memref<2x2xf32, #tpu.memory_space<vmem>>, vector<2x2xf32>
    tpu.vector_store %arg15[%c0_102, %c0_103], %245 {strides = array<i32>} : memref<2x2xf32, #tpu.memory_space<vmem>>, vector<2x2xf32>,
    return
  }
  func.func @transform_0(%arg0: i32) -> (i32, i32) {
    %c0_i32 = arith.constant 0 : i32
    %c0_i32_0 = arith.constant 0 : i32
    %c0_i32_1 = arith.constant 0 : i32
    return %c0_i32, %c0_i32_0 : i32, i32
  }
  func.func @transform_1(%arg0: i32) -> (i32, i32) {
    %c0_i32 = arith.constant 0 : i32
    %c0_i32_0 = arith.constant 0 : i32
    %c0_i32_1 = arith.constant 0 : i32
    return %c0_i32, %c0_i32_0 : i32, i32
  }
  func.func @transform_2(%arg0: i32) -> (i32, i32) {
    %c0_i32 = arith.constant 0 : i32
    %c0_i32_0 = arith.constant 0 : i32
    %c0_i32_1 = arith.constant 0 : i32
    return %c0_i32, %c0_i32_0 : i32, i32
  }
  func.func @transform_3(%arg0: i32) -> (i32, i32) {
    %c0_i32 = arith.constant 0 : i32
    %c0_i32_0 = arith.constant 0 : i32
    %c0_i32_1 = arith.constant 0 : i32
    return %c0_i32, %c0_i32_0 : i32, i32
  }
  func.func @transform_4(%arg0: i32) -> (i32, i32) {
    %c0_i32 = arith.constant 0 : i32
    %c0_i32_0 = arith.constant 0 : i32
    %c0_i32_1 = arith.constant 0 : i32
    return %c0_i32, %c0_i32_0 : i32, i32
  }
  func.func @transform_5(%arg0: i32) -> (i32, i32) {
    %c0_i32 = arith.constant 0 : i32
    %c0_i32_0 = arith.constant 0 : i32
    %c0_i32_1 = arith.constant 0 : i32
    return %c0_i32, %c0_i32_0 : i32, i32
  }
  func.func @transform_6(%arg0: i32) -> (i32, i32) {
    %c0_i32 = arith.constant 0 : i32
    %c0_i32_0 = arith.constant 0 : i32
    %c0_i32_1 = arith.constant 0 : i32
    return %c0_i32, %c0_i32_0 : i32, i32
  }
  func.func @transform_7(%arg0: i32) -> (i32, i32) {
    %c0_i32 = arith.constant 0 : i32
    %c0_i32_0 = arith.constant 0 : i32
    %c0_i32_1 = arith.constant 0 : i32
    return %c0_i32, %c0_i32_0 : i32, i32
  }
  func.func @transform_8(%arg0: i32) -> (i32, i32) {
    %c0_i32 = arith.constant 0 : i32
    %c0_i32_0 = arith.constant 0 : i32
    %c0_i32_1 = arith.constant 0 : i32
    return %c0_i32, %c0_i32_0 : i32, i32
  }
  func.func @transform_9(%arg0: i32) -> (i32, i32) {
    %c0_i32 = arith.constant 0 : i32
    %c0_i32_0 = arith.constant 0 : i32
    %c0_i32_1 = arith.constant 0 : i32
    return %c0_i32, %c0_i32_0 : i32, i32
  }
  func.func @transform_10(%arg0: i32) -> (i32, i32) {
    %c0_i32 = arith.constant 0 : i32
    %c0_i32_0 = arith.constant 0 : i32
    %c0_i32_1 = arith.constant 0 : i32
    return %c0_i32, %c0_i32_0 : i32, i32
  }
  func.func @transform_11(%arg0: i32) -> (i32, i32) {
    %c0_i32 = arith.constant 0 : i32
    %c0_i32_0 = arith.constant 0 : i32
    %c0_i32_1 = arith.constant 0 : i32
    return %c0_i32, %c0_i32_0 : i32, i32
  }
  func.func @transform_12(%arg0: i32) -> (i32, i32) {
    %c0_i32 = arith.constant 0 : i32
    %c0_i32_0 = arith.constant 0 : i32
    %c0_i32_1 = arith.constant 0 : i32
    return %c0_i32, %c0_i32_0 : i32, i32
  }
  func.func @transform_13(%arg0: i32) -> (i32, i32) {
    %c0_i32 = arith.constant 0 : i32
    %c0_i32_0 = arith.constant 0 : i32
    %c0_i32_1 = arith.constant 0 : i32
    return %c0_i32, %c0_i32_0 : i32, i32
  }
  func.func @transform_14(%arg0: i32) -> (i32, i32) {
    %c0_i32 = arith.constant 0 : i32
    %c0_i32_0 = arith.constant 0 : i32
    %c0_i32_1 = arith.constant 0 : i32
    return %c0_i32, %c0_i32_0 : i32, i32
  }
}

</mosaic_0001>

<bundles_post_ra>
// kernel: masked_dale_forward.1
= control target key start
LH: loop header
LB: loop body
LE: loop exit
PB: predicated region body
PF: predicated region fallthrough
CT: control target
= control target key end

     0   :  { %vm71_vm0 = vcmask 588800   ;;  %v2692_v5 = vmov 0   ;;  %s3519_s0 = inlined_call_operand.vmem [shape: f32[72,128], index: 0, kind: input, shape index: {}]   ;;  %s3520_s1 = inlined_call_operand.vmem [shape: f32[16,72], index: 1, kind: input, shape index: {}]   ;;  %s3521_s2 = inlined_call_operand.vmem [shape: f32[16,1], index: 2, kind: input, shape index: {}]   ;;  %s3522_s3 = inlined_call_operand.vmem [shape: f32[1024,16], index: 3, kind: input, shape index: {}]   ;;  %s3523_s4 = inlined_call_operand.vmem [shape: f32[1,16], index: 4, kind: input, shape index: {}]   ;;  %s3524_s5 = inlined_call_operand.vmem [shape: f32[16,32], index: 5, kind: input, shape index: {}]   ;;  %s3525_s6 = inlined_call_operand.vmem [shape: f32[32,128], index: 6, kind: input, shape index: {}]   ;;  %s3526_s7 = inlined_call_operand.vmem [shape: f32[32,128], index: 7, kind: input, shape index: {}]   ;;  %s3527_s8 = inlined_call_operand.vmem [shape: f32[1,128], index: 8, kind: input, shape index: {}]   ;;  %s3528_s9 = inlined_call_operand.vmem [shape: f32[16,64], index: 9, kind: input, shape index: {}]   ;;  %s3529_s10 = inlined_call_operand.vmem [shape: f32[32,64], index: 10, kind: input, shape index: {}]   ;;  %s3530_s11 = inlined_call_operand.vmem [shape: f32[1,64], index: 11, kind: input, shape index: {}]   ;;  %s3531_s12 = inlined_call_operand.vmem [shape: f32[64,2], index: 12, kind: input, shape index: {}]   ;;  %s3532_s13 = inlined_call_operand.vmem [shape: f32[1,2], index: 13, kind: input, shape index: {}]   ;;  %s3533_s14 = inlined_call_operand.hbm [shape: f32[2,2], index: 14, kind: output, shape index: {}]  }
   0x1   :  { %v50_v0 = vld [vmem:[%s3519_s0] sm:$0xff]  ;;  %v51_v1 = vld [vmem:[%s3519_s0 + $0x8] sm:$0xff]  ;;  %v52_v2 = vld [vmem:[%s3519_s0 + $0x10] sm:$0xff]  ;;  %2601 = vset.pattern.permute.xlu0 %v2692_v5 }
   0x2   :  { %v2372_v3 = vpack.c.bf16 %v51_v1, %v50_v0  ;;  %v53_v4 = vld [vmem:[%s3519_s0 + $0x18] sm:$0xff]  ;;  %v54_v7 = vld [vmem:[%s3519_s0 + $0x20] sm:$0xff]  ;;  %v55_v8 = vld [vmem:[%s3519_s0 + $0x28] sm:$0xff] }
   0x3   :  { %v2376_v6 = vpack.c.bf16 %v53_v4, %v52_v2  ;;  %v48_v9 = vld [vmem:[%s3520_s1] sm:$0xff] }
   0x4   :  { %2373 = vmatprep.subr.bf16.mxu0 %v2372_v3  ;;  %v59_v10 = vld [vmem:[%s3521_s2] sm:$0xff]  ;;  %2233 = vmatprep.mubr.msk.f32.mxu0 %vm71_vm0, %v48_v9 }
   0x5   :  { %2375 = vmatpush3.bf16.msra.mxu0 %v2372_v3 }
   0x6   :  { %19 = vsyncpa [#allocation4], 0  ;;  %2377 = vmatprep.subr.bf16.mxu0 %v2376_v6  ;;  %v2380_v11 = vpack.c.bf16 %v55_v8, %v54_v7  ;;  %63 = vperm.xlu0 %2601, %v59_v10   ;;  %v56_v12 = vld [vmem:[%s3519_s0 + $0x30] sm:$0xff]  ;;  %v57_v13 = vld [vmem:[%s3519_s0 + $0x38] sm:$0xff]  ;;  %v2693_v33 = vmov 1983009808   ;;  %v161_v35 = vlaneseq }
   0x7   :  { %v60_v14 = vld [vmem:[%s3521_s2 + $0x8] sm:$0xff]  ;;  %v2384_v15 = vpack.c.bf16 %v57_v13, %v56_v12  ;;  %v58_v16 = vld [vmem:[%s3519_s0 + $0x40] sm:$0xff]  ;;  %v323_v31 = vld [vmem:[%s3522_s3 + $0x90] sm:$0xff]  ;;  %v159_v34 = vunpack.c.l.s4 %v2693_v33  ;;  %vm155_vm1 = vcmask 516096   ;;  %s2694_s26 = smov 64   ;;  %vm174_vm2 = vcmask 1040896  }
   0x8   :  { %v49_v17 = vld [vmem:[%s3520_s1 + $0x8] sm:$0xff]  ;;  %v321_v18 = vld [vmem:[%s3522_s3 + $0x80] sm:$0xff]  ;;  %v324_v32 = vld [vmem:[%s3522_s3 + $0x98] sm:$0xff]  ;;  %v162_v49 = vshrl.u32 %v161_v35, 7  ;;  %vm777_vm3 = vcmask 261120   ;;  %vm2696_vm4 = vmmov 0  }
   0x9   :  { %2379 = vmatpush3.bf16.msra.mxu0 %v2376_v6  ;;  %v322_v19 = vld [vmem:[%s3522_s3 + $0x88] sm:$0xff]  ;;  %v305_v20 = vld [vmem:[%s3522_s3] sm:$0xff]  ;;  %v2392_v36 = vpack.c.bf16 %v324_v32, %v323_v31  ;;  %v307_v37 = vld [vmem:[%s3522_s3 + $0x10] sm:$0xff]  ;;  %v160_v48 = vunpack.c.0.s8 %v159_v34  ;;  %vm1787_vm5 = vcmask 130048   ;;  %vm1885_vm6 = vcmask 523264   ;;  %s2699_s0 = smov [#allocation3]  }
   0xa   :  { %2381 = vmatprep.subr.bf16.mxu0 %v2380_v11  ;;  %68 = vperm.xlu0 %2601, %v60_v14   ;;  %v2388_v21 = vpack.c.bf16 %v322_v19, %v321_v18  ;;  %v306_v22 = vld [vmem:[%s3522_s3 + $0x8] sm:$0xff]  ;;  %v353_v23 = vld [vmem:[%s3522_s3 + $0x180] sm:$0xff]  ;;  %v308_v38 = vld [vmem:[%s3522_s3 + $0x18] sm:$0xff]  ;;  %s1967_s28 = sshll.u32 %s2699_s0, 4  ;;  %vm1959_vm7 = vcmask 9216   ;;  %s1968_s28 = int_to_ptr.vmem [resolvable:$true] %s1967_s28 }
   0xb   :  { %v354_v24 = vld [vmem:[%s3522_s3 + $0x188] sm:$0xff]  ;;  %v2390_v25 = vpack.c.bf16 %v306_v22, %v305_v20  ;;  %v337_v27 = vld [vmem:[%s3522_s3 + $0x100] sm:$0xff]  ;;  %v2394_v39 = vpack.c.bf16 %v308_v38, %v307_v37  ;;  %v355_v40 = vld [vmem:[%s3522_s3 + $0x190] sm:$0xff]  ;;  %v2894_v2 = vsub.s32 %v160_v48, %v162_v49  ;;  %p2673_p1 = scmp.lt.s32.totalorder %s1968_s28, %s1968_s28 }
   0xc   :  { %v2420_v26 = vpack.c.bf16 %v354_v24, %v353_v23  ;;  %v338_v28 = vld [vmem:[%s3522_s3 + $0x108] sm:$0xff]  ;;  %2389 = vmatprep.subr.bf16.mxu1 %v2388_v21  ;;  %v356_v41 = vld [vmem:[%s3522_s3 + $0x198] sm:$0xff]  ;;  %v339_v43 = vld [vmem:[%s3522_s3 + $0x110] sm:$0xff] }
   0xd   :  { %2383 = vmatpush3.bf16.msra.mxu0 %v2380_v11  ;;  %v2422_v29 = vpack.c.bf16 %v338_v28, %v337_v27  ;;  %2391 = vmatpush3.bf16.msra.mxu1 %v2390_v25  ;;  %v2424_v42 = vpack.c.bf16 %v356_v41, %v355_v40  ;;  %v340_v44 = vld [vmem:[%s3522_s3 + $0x118] sm:$0xff]  ;;  %v325_v46 = vld [vmem:[%s3522_s3 + $0xa0] sm:$0xff]  ;;  %v326_v47 = vld [vmem:[%s3522_s3 + $0xa8] sm:$0xff] }
   0xe   :  { %2385 = vmatprep.subr.bf16.mxu0 %v2384_v15  ;;  %2393 = vmatprep.subr.bf16.mxu1 %v2392_v36  ;;  %v2426_v45 = vpack.c.bf16 %v340_v44, %v339_v43  ;;  %v2396_v50 = vpack.c.bf16 %v326_v47, %v325_v46  ;;  %v309_v51 = vld [vmem:[%s3522_s3 + $0x20] sm:$0xff]  ;;  %v310_v52 = vld [vmem:[%s3522_s3 + $0x28] sm:$0xff]  ;;  %v327_v62 = vld [vmem:[%s3522_s3 + $0xb0] sm:$0xff] }
   0xf   :  { %v2398_v54 = vpack.c.bf16 %v310_v52, %v309_v51  ;;  %v357_v55 = vld [vmem:[%s3522_s3 + $0x1a0] sm:$0xff]  ;;  %v358_v56 = vld [vmem:[%s3522_s3 + $0x1a8] sm:$0xff]  ;;  %v328_v63 = vld [vmem:[%s3522_s3 + $0xb8] sm:$0xff] }
  0x10   :  { %v2428_v57 = vpack.c.bf16 %v358_v56, %v357_v55  ;;  %v341_v58 = vld [vmem:[%s3522_s3 + $0x120] sm:$0xff]  ;;  %v342_v59 = vld [vmem:[%s3522_s3 + $0x128] sm:$0xff]  ;;  %v2400_v3 = vpack.c.bf16 %v328_v63, %v327_v62  ;;  %v311_v4 = vld [vmem:[%s3522_s3 + $0x30] sm:$0xff] }
  0x11   :  { %2387 = vmatpush3.bf16.msra.mxu0 %v2384_v15  ;;  %2395 = vmatpush3.bf16.msra.mxu1 %v2394_v39  ;;  %v2430_v61 = vpack.c.bf16 %v342_v59, %v341_v58  ;;  %v312_v5 = vld [vmem:[%s3522_s3 + $0x38] sm:$0xff]  ;;  %v359_v8 = vld [vmem:[%s3522_s3 + $0x1b0] sm:$0xff]  ;;  %v313_v21 = vld [vmem:[%s3522_s3 + $0x40] sm:$0xff] }
  0x12   :  { %2231 = vmatprep.subr.mxu0 %v58_v16  ;;  %2397 = vmatprep.subr.bf16.mxu1 %v2396_v50  ;;  %v2402_v7 = vpack.c.bf16 %v312_v5, %v311_v4  ;;  %v360_v9 = vld [vmem:[%s3522_s3 + $0x1b8] sm:$0xff]  ;;  %v343_v12 = vld [vmem:[%s3522_s3 + $0x130] sm:$0xff]  ;;  %v314_v22 = vld [vmem:[%s3522_s3 + $0x48] sm:$0xff] }
  0x13   :  { %v2432_v11 = vpack.c.bf16 %v360_v9, %v359_v8  ;;  %v344_v13 = vld [vmem:[%s3522_s3 + $0x138] sm:$0xff]  ;;  %v2406_v25 = vpack.c.bf16 %v314_v22, %v313_v21  ;;  %v362_v27 = vld [vmem:[%s3522_s3 + $0x1c8] sm:$0xff]  ;;  %v345_v31 = vld [vmem:[%s3522_s3 + $0x140] sm:$0xff] }
  0x14   :  { %v2434_v15 = vpack.c.bf16 %v344_v13, %v343_v12  ;;  %v346_v32 = vld [vmem:[%s3522_s3 + $0x148] sm:$0xff]  ;;  %v331_v37 = vld [vmem:[%s3522_s3 + $0xd0] sm:$0xff]  ;;  %v332_v38 = vld [vmem:[%s3522_s3 + $0xd8] sm:$0xff] }
  0x15   :  { %2232 = vmatpush3.msra.mxu0 %v58_v16  ;;  %2399 = vmatpush3.bf16.msra.mxu1 %v2398_v54  ;;  %v329_v16 = vld [vmem:[%s3522_s3 + $0xc0] sm:$0xff]  ;;  %v2438_v36 = vpack.c.bf16 %v346_v32, %v345_v31  ;;  %v315_v40 = vld [vmem:[%s3522_s3 + $0x50] sm:$0xff]  ;;  %v316_v41 = vld [vmem:[%s3522_s3 + $0x58] sm:$0xff] }
  0x16   :  { %2234 = vmatmul.mubr.msk.f32.vlgmr.msra.gmra.mrb[0].mxu0 %vm71_vm0, %v49_v17  ;;  %2421 = vmatprep.subr.bf16.mxu0 %v2420_v26  ;;  %v330_v17 = vld [vmem:[%s3522_s3 + $0xc8] sm:$0xff]  ;;  %v361_v26 = vld [vmem:[%s3522_s3 + $0x1c0] sm:$0xff]  ;;  %v363_v43 = vld [vmem:[%s3522_s3 + $0x1d0] sm:$0xff]  ;;  %v2410_v50 = vpack.c.bf16 %v316_v41, %v315_v40 }
  0x17   :  { %2423 = vmatpush3.bf16.msra.mxu0 %v2422_v29  ;;  %2401 = vmatprep.subr.bf16.mxu1 %v2400_v3  ;;  %v2404_v20 = vpack.c.bf16 %v330_v17, %v329_v16  ;;  %v364_v44 = vld [vmem:[%s3522_s3 + $0x1d8] sm:$0xff]  ;;  %v347_v46 = vld [vmem:[%s3522_s3 + $0x150] sm:$0xff]  ;;  %v333_v51 = vld [vmem:[%s3522_s3 + $0xe0] sm:$0xff] }
  0x18   :  { %2425 = vmatprep.subr.bf16.mxu0 %v2424_v42  ;;  %v348_v47 = vld [vmem:[%s3522_s3 + $0x158] sm:$0xff]  ;;  %v334_v52 = vld [vmem:[%s3522_s3 + $0xe8] sm:$0xff]  ;;  %v317_v56 = vld [vmem:[%s3522_s3 + $0x60] sm:$0xff] }
  0x19   :  { %2403 = vmatpush3.bf16.msra.mxu1 %v2402_v7  ;;  %v2442_v54 = vpack.c.bf16 %v348_v47, %v347_v46  ;;  %v2412_v55 = vpack.c.bf16 %v334_v52, %v333_v51  ;;  %v349_v63 = vld [vmem:[%s3522_s3 + $0x160] sm:$0xff]  ;;  %v335_v4 = vld [vmem:[%s3522_s3 + $0xf0] sm:$0xff]  ;;  %v336_v5 = vld [vmem:[%s3522_s3 + $0xf8] sm:$0xff] }
  0x1a   :  { %2405 = vmatprep.subr.bf16.mxu1 %v2404_v20  ;;  %v319_v7 = vld [vmem:[%s3522_s3 + $0x70] sm:$0xff]  ;;  %v320_v8 = vld [vmem:[%s3522_s3 + $0x78] sm:$0xff]  ;;  %v386_v20 = vld [vmem:[%s3522_s3 + $0x288] sm:$0xff] }
  0x1b   :  { %2427 = vmatpush3.bf16.msra.mxu0 %v2426_v45  ;;  %v2408_v45 = vpack.c.bf16 %v332_v38, %v331_v37  ;;  %v367_v12 = vld [vmem:[%s3522_s3 + $0x1f0] sm:$0xff]  ;;  %v368_v13 = vld [vmem:[%s3522_s3 + $0x1f8] sm:$0xff]  ;;  %v369_v47 = vld [vmem:[%s3522_s3 + $0x200] sm:$0xff] }
  0x1c   :  { %2429 = vmatprep.subr.bf16.mxu0 %v2428_v57  ;;  %v318_v57 = vld [vmem:[%s3522_s3 + $0x68] sm:$0xff]  ;;  %v352_v16 = vld [vmem:[%s3522_s3 + $0x178] sm:$0xff]  ;;  %v387_v51 = vld [vmem:[%s3522_s3 + $0x290] sm:$0xff] }
  0x1d   :  { %2407 = vmatpush3.bf16.msra.mxu1 %v2406_v25  ;;  %v2414_v59 = vpack.c.bf16 %v318_v57, %v317_v56  ;;  %v388_v52 = vld [vmem:[%s3522_s3 + $0x298] sm:$0xff] }
  0x1e   :  { %2409 = vmatprep.subr.bf16.mxu1 %v2408_v45 }
  0x1f   :  { %2431 = vmatpush3.bf16.msra.mxu0 %v2430_v61  ;;  %v366_v61 = vld [vmem:[%s3522_s3 + $0x1e8] sm:$0xff] }
  0x20   :  { %2433 = vmatprep.subr.bf16.mxu0 %v2432_v11  ;;  %v2418_v11 = vpack.c.bf16 %v320_v8, %v319_v7  ;;  %v403_v7 = vld [vmem:[%s3522_s3 + $0x310] sm:$0xff]  ;;  %v404_v8 = vld [vmem:[%s3522_s3 + $0x318] sm:$0xff] }
  0x21   :  { %2411 = vmatpush3.bf16.msra.mxu1 %v2410_v50 }
  0x22   :  { %2413 = vmatprep.subr.bf16.mxu1 %v2412_v55  ;;  %v402_v55 = vld [vmem:[%s3522_s3 + $0x308] sm:$0xff] }
  0x23   :  { %2435 = vmatpush3.bf16.msra.mxu0 %v2434_v15  ;;  %v351_v15 = vld [vmem:[%s3522_s3 + $0x170] sm:$0xff] }
  0x24   :  { %v2450_v17 = vpack.c.bf16 %v352_v16, %v351_v15  ;;  %v374_v15 = vld [vmem:[%s3522_s3 + $0x228] sm:$0xff]  ;;  %v2490_v16 = vpack.c.bf16 %v404_v8, %v403_v7  ;;  %v399_v7 = vld [vmem:[%s3522_s3 + $0x2f0] sm:$0xff]  ;;  %v400_v8 = vld [vmem:[%s3522_s3 + $0x2f8] sm:$0xff] }
  0x25   :  { %2415 = vmatpush3.bf16.msra.mxu1 %v2414_v59  ;;  %v419_v59 = vld [vmem:[%s3522_s3 + $0x390] sm:$0xff] }
  0x85   :  { %v64_v30 = vpop.permute.xlu0 %63 }
  0x89   :  { %v69_v53 = vpop.permute.xlu0 %68 }
  0xe9   :  { %v2235_v60 = vpop.f32.mrb[0].mxu0 }
  0xea   :  { %v150_v0 = vadd.f32 %v2235_v60, %v69_v53  ;;  %v144_v1 = vpop.f32.mrb[1].mxu0  ;;  %v2440_v53 = vpack.c.bf16 %v364_v44, %v363_v43  ;;  %v365_v60 = vld [vmem:[%s3522_s3 + $0x1e0] sm:$0xff] }
  0xeb   :  { %v145_v6 = vadd.f32 %v144_v1, %v64_v30  ;;  %v2436_v30 = vpack.c.bf16 %v362_v27, %v361_v26  ;;  %v2444_v62 = vpack.c.bf16 %v366_v61, %v365_v60  ;;  %v420_v60 = vld [vmem:[%s3522_s3 + $0x398] sm:$0xff] }
  0xec   :  { %v154_v10 = vmax.f32 %v150_v0, 0.0  ;;  %v350_v0 = vld [vmem:[%s3522_s3 + $0x168] sm:$0xff] }
  0xed   :  { %v153_v14 = vmax.f32 %v145_v6, 0.0  ;;  %2437 = vmatprep.subr.bf16.mxu0 %v2436_v30  ;;  %v2446_v3 = vpack.c.bf16 %v350_v0, %v349_v63  ;;  %v2416_v6 = vpack.c.bf16 %v336_v5, %v335_v4  ;;  %v371_v63 = vld [vmem:[%s3522_s3 + $0x210] sm:$0xff]  ;;  %v372_v0 = vld [vmem:[%s3522_s3 + $0x218] sm:$0xff]  ;;  %v389_v4 = vld [vmem:[%s3522_s3 + $0x2a0] sm:$0xff] }
  0xee   :  { %v266_v18 = vcombine.high %v154_v10, %v154_v10  ;;  %v2921_v19 = vrot.slane %v154_v10, %v2894_v2  ;;  %230 = vst.msk [vmem:[#allocation2 + $0x8] sm:$0x1] %vm155_vm1, %v154_v10  ;;  %2439 = vmatpush3.bf16.msra.mxu0 %v2438_v36  ;;  %v390_v5 = vld [vmem:[%s3522_s3 + $0x2a8] sm:$0xff] }
  0xef   :  { %v193_v23 = vcombine.high %v153_v14, %v153_v14  ;;  %v164_v24 = vrot.slane %v153_v14, %v2894_v2  ;;  %156 = vst.msk [vmem:[#allocation2] sm:$0x1] %vm155_vm1, %v153_v14  ;;  %2441 = vmatprep.subr.bf16.mxu0 %v2440_v53  ;;  %2417 = vmatprep.subr.bf16.mxu1 %v2416_v6 }
  0xf0   :  { %v2939_v28 = vrot.slane %v266_v18, %v2894_v2  ;;  %v2943_v29 = vcombine.high %v2921_v19, %v2921_v19  ;;  %v2448_v14 = vpack.c.bf16 %v368_v13, %v367_v12  ;;  %v385_v18 = vld [vmem:[%s3522_s3 + $0x280] sm:$0xff]  ;;  %2419 = vmatpush3.bf16.msra.mxu1 %v2418_v11  ;;  %v243_v25 = vrot.slane %v2921_v19, 7  ;;  %v422_v11 = vld [vmem:[%s3522_s3 + $0x3a8] sm:$0xff] }
  0xf1   :  { %165 = vrot.lane.b32.xlu1 %v164_v24, %s2694_s26  ;;  %v200_v33 = vrot.slane %v193_v23, %v2894_v2  ;;  %v178_v34 = vcombine.high %v164_v24, %v164_v24  ;;  %v169_v35 = vrot.slane %v164_v24, 7  ;;  %v2452_v21 = vpack.c.bf16 %v386_v20, %v385_v18  ;;  %v417_v23 = vld [vmem:[%s3522_s3 + $0x380] sm:$0xff]  ;;  %v418_v24 = vld [vmem:[%s3522_s3 + $0x388] sm:$0xff]  ;;  %v392_v18 = vld [vmem:[%s3522_s3 + $0x2b8] sm:$0xff] }
  0xf2   :  { %v2961_v39 = vcombine.high %v2939_v28, %v2939_v28  ;;  %253 = vst.msk [vmem:[#allocation2 + $0xa] sm:$0x1] %vm155_vm1, %v2943_v29  ;;  %275 = vst.msk [vmem:[#allocation2 + $0xc] sm:$0x1] %vm155_vm1, %v2939_v28  ;;  %2443 = vmatpush3.bf16.msra.mxu0 %v2442_v54  ;;  %v2484_v26 = vpack.c.bf16 %v418_v24, %v417_v23  ;;  %v244_v27 = vrot.slane %v243_v25, 2  ;;  %v280_v30 = vrot.slane %v2939_v28, 7 }
  0xf3   :  { %203 = vrot.lane.b32.xlu0 %v200_v33, %s2694_s26  ;;  %v2974_v42 = vcombine.high %v200_v33, %v200_v33  ;;  %180 = vst.msk [vmem:[#allocation2 + $0x2] sm:$0x1] %vm155_vm1, %v178_v34  ;;  %202 = vst.msk [vmem:[#allocation2 + $0x4] sm:$0x1] %vm155_vm1, %v200_v33  ;;  %v2993_v48 = vrot.slane %v169_v35, 2  ;;  %v207_v49 = vrot.slane %v200_v33, 7  ;;  %2445 = vmatprep.subr.bf16.mxu0 %v2444_v62 }
  0xf4   :  { %290 = vst.msk [vmem:[#allocation2 + $0xe] sm:$0x1] %vm155_vm1, %v2961_v39  ;;  %v185_v58 = vrot.slane %v178_v34, 7  ;;  %2453 = vmatprep.subr.bf16.mxu1 %v2452_v21  ;;  %v258_v31 = vrot.slane %v2943_v29, 7  ;;  %v295_v33 = vrot.slane %v2961_v39, 7  ;;  %v401_v54 = vld [vmem:[%s3522_s3 + $0x300] sm:$0xff]  ;;  %v2456_v62 = vpack.c.bf16 %v388_v52, %v387_v51 }
  0xf5   :  { %181 = vrot.lane.b32.xlu1 %v178_v34, %s2694_s26  ;;  %217 = vst.msk [vmem:[#allocation2 + $0x6] sm:$0x1] %vm155_vm1, %v2974_v42  ;;  %v208_v1 = vrot.slane %v207_v49, 2  ;;  %v222_v10 = vrot.slane %v2974_v42, 7  ;;  %v2488_v6 = vpack.c.bf16 %v420_v60, %v419_v59  ;;  %v2460_v13 = vpack.c.bf16 %v390_v5, %v389_v4  ;;  %v405_v21 = vld [vmem:[%s3522_s3 + $0x320] sm:$0xff]  ;;  %v423_v24 = vld [vmem:[%s3522_s3 + $0x3b0] sm:$0xff] }
  0xf6   :  { %v186_v9 = vrot.slane %v185_v58, 2  ;;  %2447 = vmatpush3.bf16.msra.mxu0 %v2446_v3  ;;  %v259_v32 = vrot.slane %v258_v31, 2  ;;  %v296_v34 = vrot.slane %v295_v33, 2  ;;  %v2486_v3 = vpack.c.bf16 %v402_v55, %v401_v54  ;;  %v424_v25 = vld [vmem:[%s3522_s3 + $0x3b8] sm:$0xff]  ;;  %v427_v52 = vld [vmem:[%s3522_s3 + $0x3d0] sm:$0xff]  ;;  %v398_v59 = vld [vmem:[%s3522_s3 + $0x2e8] sm:$0xff] }
  0xf7   :  { %171 = vrot.lane.b32.xlu0 %v2993_v48, %s2694_s26  ;;  %2449 = vmatprep.subr.bf16.mxu0 %v2448_v14  ;;  %v223_v22 = vrot.slane %v222_v10, 2  ;;  %v421_v10 = vld [vmem:[%s3522_s3 + $0x3a0] sm:$0xff]  ;;  %v2496_v33 = vpack.c.bf16 %v424_v25, %v423_v24  ;;  %v379_v55 = vld [vmem:[%s3522_s3 + $0x250] sm:$0xff]  ;;  %v382_v5 = vld [vmem:[%s3522_s3 + $0x268] sm:$0xff] }
  0xf8   :  { %v373_v14 = vld [vmem:[%s3522_s3 + $0x220] sm:$0xff]  ;;  %v2492_v20 = vpack.c.bf16 %v422_v11, %v421_v10  ;;  %v414_v11 = vld [vmem:[%s3522_s3 + $0x368] sm:$0xff]  ;;  %v416_v24 = vld [vmem:[%s3522_s3 + $0x378] sm:$0xff] }
  0xf9   :  { %218 = vrot.lane.b32.xlu1 %v2974_v42, %s2694_s26  ;;  %v2462_v23 = vpack.c.bf16 %v374_v15, %v373_v14  ;;  %v381_v4 = vld [vmem:[%s3522_s3 + $0x260] sm:$0xff]  ;;  %v432_v14 = vld [vmem:[%s3522_s3 + $0x3f8] sm:$0xff]  ;;  %v2480_v15 = vpack.c.bf16 %v400_v8, %v399_v7 }
  0xfa   :  { %2451 = vmatpush3.bf16.msra.mxu0 %v2450_v17  ;;  %v391_v17 = vld [vmem:[%s3522_s3 + $0x2b0] sm:$0xff]  ;;  %v413_v10 = vld [vmem:[%s3522_s3 + $0x360] sm:$0xff] }
  0xfb   :  { %209 = vrot.lane.b32.xlu0 %v208_v1, %s2694_s26  ;;  %2485 = vmatprep.subr.bf16.mxu0 %v2484_v26  ;;  %v2464_v26 = vpack.c.bf16 %v392_v18, %v391_v17  ;;  %v384_v17 = vld [vmem:[%s3522_s3 + $0x278] sm:$0xff]  ;;  %v2510_v18 = vpack.c.bf16 %v414_v11, %v413_v10 }
  0xfd   :  { %187 = vrot.lane.b32.xlu1 %v186_v9, %s2694_s26 }
  0xff   :  { %239 = vrot.lane.b32.xlu0 %v2921_v19, %s2694_s26  ;;  %v281_v19 = vrot.slane %v280_v30, 2  ;;  %v376_v30 = vld [vmem:[%s3522_s3 + $0x238] sm:$0xff] }
 0x101   :  { %224 = vrot.lane.b32.xlu1 %v223_v22, %s2694_s26 }
 0x103   :  { %276 = vrot.lane.b32.xlu0 %v2939_v28, %s2694_s26 }
 0x105   :  { %254 = vrot.lane.b32.xlu1 %v2943_v29, %s2694_s26 }
 0x107   :  { %245 = vrot.lane.b32.xlu0 %v244_v27, %s2694_s26 }
 0x109   :  { %291 = vrot.lane.b32.xlu1 %v2961_v39, %s2694_s26 }
 0x10b   :  { %282 = vrot.lane.b32.xlu0 %v281_v19, %s2694_s26 }
 0x10d   :  { %260 = vrot.lane.b32.xlu1 %v259_v32, %s2694_s26 }
 0x111   :  { %297 = vrot.lane.b32.xlu1 %v296_v34, %s2694_s26 }
 0x163   :  { %v166_v28 = vpop.permute.xlu1 %165 }
 0x164   :  { %168 = vst.msk [vmem:[#allocation2 + $0x1] sm:$0x1] %vm155_vm1, %v166_v28  ;;  %v408_v28 = vld [vmem:[%s3522_s3 + $0x338] sm:$0xff] }
 0x165   :  { %177 = vst.msk [vmem:[#allocation2 + $0x1] sm:$0x1] %vm174_vm2, %v2993_v48  ;;  %v204_v29 = vpop.permute.xlu0 %203  ;;  %v370_v48 = vld [vmem:[%s3522_s3 + $0x208] sm:$0xff] }
 0x166   :  { %206 = vst.msk [vmem:[#allocation2 + $0x5] sm:$0x1] %vm155_vm1, %v204_v29  ;;  %v2454_v57 = vpack.c.bf16 %v370_v48, %v369_v47  ;;  %v409_v47 = vld [vmem:[%s3522_s3 + $0x340] sm:$0xff]  ;;  %v410_v48 = vld [vmem:[%s3522_s3 + $0x348] sm:$0xff] }
 0x167   :  { %214 = vst.msk [vmem:[#allocation2 + $0x5] sm:$0x1] %vm174_vm2, %v208_v1  ;;  %v182_v35 = vpop.permute.xlu1 %181 }
 0x168   :  { %184 = vst.msk [vmem:[#allocation2 + $0x3] sm:$0x1] %vm155_vm1, %v182_v35  ;;  %v425_v35 = vld [vmem:[%s3522_s3 + $0x3c0] sm:$0xff] }
 0x169   :  { %192 = vst.msk [vmem:[#allocation2 + $0x3] sm:$0x1] %vm174_vm2, %v186_v9  ;;  %v172_v36 = vpop.permute.xlu0 %171  ;;  %v2458_v9 = vpack.c.bf16 %v372_v0, %v371_v63  ;;  %v429_v0 = vld [vmem:[%s3522_s3 + $0x3e0] sm:$0xff] }
 0x16a   :  { %175 = vst.msk [vmem:[#allocation2] sm:$0x1] %vm174_vm2, %v172_v36  ;;  %v426_v36 = vld [vmem:[%s3522_s3 + $0x3c8] sm:$0xff] }
 0x16b   :  { %v219_v37 = vpop.permute.xlu1 %218 }
 0x16c   :  { %221 = vst.msk [vmem:[#allocation2 + $0x7] sm:$0x1] %vm155_vm1, %v219_v37 }
 0x16d   :  { %229 = vst.msk [vmem:[#allocation2 + $0x7] sm:$0x1] %vm174_vm2, %v223_v22  ;;  %v210_v38 = vpop.permute.xlu0 %209  ;;  %v406_v22 = vld [vmem:[%s3522_s3 + $0x328] sm:$0xff] }
 0x16e   :  { %212 = vst.msk [vmem:[#allocation2 + $0x4] sm:$0x1] %vm174_vm2, %v210_v38  ;;  %v2494_v31 = vpack.c.bf16 %v406_v22, %v405_v21  ;;  %v767_v21 = vld [vmem:[%s3525_s6 + $0x8] sm:$0xff] }
 0x16f   :  { %v188_v39 = vpop.permute.xlu1 %187 }
 0x170   :  { %190 = vst.msk [vmem:[#allocation2 + $0x2] sm:$0x1] %vm174_vm2, %v188_v39  ;;  %v377_v39 = vld [vmem:[%s3522_s3 + $0x240] sm:$0xff] }
 0x171   :  { %v240_v40 = vpop.permute.xlu0 %239 }
 0x172   :  { %242 = vst.msk [vmem:[#allocation2 + $0x9] sm:$0x1] %vm155_vm1, %v240_v40  ;;  %v378_v40 = vld [vmem:[%s3522_s3 + $0x248] sm:$0xff] }
 0x173   :  { %250 = vst.msk [vmem:[#allocation2 + $0x9] sm:$0x1] %vm174_vm2, %v244_v27  ;;  %v225_v41 = vpop.permute.xlu1 %224  ;;  %v375_v27 = vld [vmem:[%s3522_s3 + $0x230] sm:$0xff] }
 0x174   :  { %227 = vst.msk [vmem:[#allocation2 + $0x6] sm:$0x1] %vm174_vm2, %v225_v41  ;;  %v2466_v29 = vpack.c.bf16 %v376_v30, %v375_v27  ;;  %v768_v30 = vld [vmem:[%s3525_s6 + $0x10] sm:$0xff] }
 0x175   :  { %v277_v42 = vpop.permute.xlu0 %276 }
 0x176   :  { %279 = vst.msk [vmem:[#allocation2 + $0xd] sm:$0x1] %vm155_vm1, %v277_v42 }
 0x177   :  { %287 = vst.msk [vmem:[#allocation2 + $0xd] sm:$0x1] %vm174_vm2, %v281_v19  ;;  %v255_v43 = vpop.permute.xlu1 %254  ;;  %v393_v19 = vld [vmem:[%s3522_s3 + $0x2c0] sm:$0xff] }
 0x178   :  { %257 = vst.msk [vmem:[#allocation2 + $0xb] sm:$0x1] %vm155_vm1, %v255_v43 }
 0x179   :  { %265 = vst.msk [vmem:[#allocation2 + $0xb] sm:$0x1] %vm174_vm2, %v259_v32  ;;  %v246_v44 = vpop.permute.xlu0 %245  ;;  %v394_v32 = vld [vmem:[%s3522_s3 + $0x2c8] sm:$0xff] }
 0x17a   :  { %248 = vst.msk [vmem:[#allocation2 + $0x8] sm:$0x1] %vm174_vm2, %v246_v44  ;;  %v2468_v37 = vpack.c.bf16 %v394_v32, %v393_v19  ;;  %v395_v44 = vld [vmem:[%s3522_s3 + $0x2d0] sm:$0xff]  ;;  %v764_v32 = vld [vmem:[%s3524_s5] sm:$0xff] }
 0x17b   :  { %v292_v45 = vpop.permute.xlu1 %291  ;;  %v303_v46 = vld [vmem:[#allocation2] sm:$0xff] }
 0x17c   :  { %294 = vst.msk [vmem:[#allocation2 + $0xf] sm:$0x1] %vm155_vm1, %v292_v45  ;;  %v442_v49 = vcombine.high %v303_v46, %v303_v46  ;;  %v449_v50 = vrot.slane %v303_v46, %v2894_v2  ;;  %v396_v45 = vld [vmem:[%s3522_s3 + $0x2d8] sm:$0xff]  ;;  %v2500_v46 = vpack.c.bf16 %v426_v36, %v425_v35  ;;  %v861_v35 = vld [vmem:[%s3526_s7 + $0x10] sm:$0xff] }
 0x17d   :  { %302 = vst.msk [vmem:[#allocation2 + $0xf] sm:$0x1] %vm174_vm2, %v296_v34  ;;  %v283_v53 = vpop.permute.xlu0 %282  ;;  %v407_v34 = vld [vmem:[%s3522_s3 + $0x330] sm:$0xff]  ;;  %v2472_v54 = vpack.c.bf16 %v396_v45, %v395_v44  ;;  %v862_v36 = vld [vmem:[%s3526_s7 + $0x18] sm:$0xff] }
 0x17e   :  { %285 = vst.msk [vmem:[#allocation2 + $0xc] sm:$0x1] %vm174_vm2, %v283_v53  ;;  %v457_v56 = vcombine.high %v449_v50, %v449_v50  ;;  %v456_v58 = vrot.slane %v442_v49, %v2894_v2  ;;  %v2498_v41 = vpack.c.bf16 %v408_v28, %v407_v34  ;;  %v428_v53 = vld [vmem:[%s3522_s3 + $0x3d8] sm:$0xff]  ;;  %v860_v34 = vld [vmem:[%s3526_s7 + $0x8] sm:$0xff]  ;;  %v2695_v28 = vmov 0.0|0.0  }
 0x17f   :  { %v261_v61 = vpop.permute.xlu1 %260  ;;  %v2504_v60 = vpack.c.bf16 %v428_v53, %v427_v52 }
 0x180   :  { %263 = vst.msk [vmem:[#allocation2 + $0xa] sm:$0x1] %vm174_vm2, %v261_v61  ;;  %548 = vmatprep.mubr.f32.mxu1 %v457_v56  ;;  %v458_v1 = vcombine.high %v456_v58, %v456_v58  ;;  %v380_v56 = vld [vmem:[%s3522_s3 + $0x258] sm:$0xff]  ;;  %v411_v61 = vld [vmem:[%s3522_s3 + $0x350] sm:$0xff] }
 0x181   :  { %549 = vmatmul.mubr.f32.vlgmr.msra.gmra.mrb[0].mxu1 %v449_v50  ;;  %v2470_v50 = vpack.c.bf16 %v378_v40, %v377_v39  ;;  %v2474_v63 = vpack.c.bf16 %v380_v56, %v379_v55  ;;  %v3338_v39 = vpack.c.bf16 %v862_v36, %v861_v35 }
 0x182   :  { %2455 = vmatpush3.bf16.msra.mxu1 %v2454_v57  ;;  %618 = vmatprep.mubr.f32.mxu0 %v458_v1  ;;  %v2502_v57 = vpack.c.bf16 %v410_v48, %v409_v47  ;;  %v430_v1 = vld [vmem:[%s3522_s3 + $0x3e8] sm:$0xff] }
 0x183   :  { %v298_v12 = vpop.permute.xlu1 %297  ;;  %619 = vmatmul.mubr.f32.vlgmr.msra.gmra.mrb[2].mxu0 %v456_v58  ;;  %2457 = vmatprep.subr.bf16.mxu1 %v2456_v62  ;;  %v397_v58 = vld [vmem:[%s3522_s3 + $0x2e0] sm:$0xff]  ;;  %v412_v62 = vld [vmem:[%s3522_s3 + $0x358] sm:$0xff] }
 0x184   :  { %300 = vst.msk [vmem:[#allocation2 + $0xe] sm:$0x1] %vm174_vm2, %v298_v12  ;;  %2487 = vmatpush3.bf16.msra.mxu0 %v2486_v3  ;;  %v2476_v3 = vpack.c.bf16 %v398_v59, %v397_v58  ;;  %v2478_v12 = vpack.c.bf16 %v382_v5, %v381_v4 }
 0x185   :  { %2489 = vmatprep.subr.bf16.mxu0 %v2488_v6  ;;  %v2506_v6 = vpack.c.bf16 %v412_v62, %v411_v61 }
 0x186   :  { %2459 = vmatpush3.bf16.msra.mxu1 %v2458_v9  ;;  %v2508_v9 = vpack.c.bf16 %v430_v1, %v429_v0 }
 0x187   :  { %2461 = vmatprep.subr.bf16.mxu1 %v2460_v13  ;;  %v431_v13 = vld [vmem:[%s3522_s3 + $0x3f0] sm:$0xff] }
 0x188   :  { %2491 = vmatpush3.bf16.msra.mxu0 %v2490_v16  ;;  %v383_v16 = vld [vmem:[%s3522_s3 + $0x270] sm:$0xff]  ;;  %v2512_v22 = vpack.c.bf16 %v432_v14, %v431_v13 }
 0x189   :  { %2493 = vmatprep.subr.bf16.mxu0 %v2492_v20  ;;  %v766_v20 = vld [vmem:[%s3525_s6] sm:$0xff]  ;;  %v2482_v25 = vpack.c.bf16 %v384_v17, %v383_v16 }
 0x18a   :  { %2463 = vmatpush3.bf16.msra.mxu1 %v2462_v23  ;;  %v415_v23 = vld [vmem:[%s3522_s3 + $0x370] sm:$0xff] }
 0x18b   :  { %2465 = vmatprep.subr.bf16.mxu1 %v2464_v26  ;;  %v304_v38 = vld [vmem:[#allocation2 + $0x8] sm:$0xff]  ;;  %v2516_v26 = vpack.c.bf16 %v767_v21, %v766_v20  ;;  %v2514_v27 = vpack.c.bf16 %v416_v24, %v415_v23 }
 0x18c   :  { %2495 = vmatpush3.bf16.msra.mxu0 %v2494_v31  ;;  %v3211_v42 = vrot.slane %v304_v38, %v2894_v2  ;;  %v459_v43 = vcombine.high %v304_v38, %v304_v38  ;;  %v769_v31 = vld [vmem:[%s3525_s6 + $0x18] sm:$0xff]  ;;  %v765_v38 = vld [vmem:[%s3524_s5 + $0x8] sm:$0xff] }
 0x18d   :  { %2497 = vmatprep.subr.bf16.mxu0 %v2496_v33  ;;  %v2520_v19 = vpack.c.bf16 %v769_v31, %v768_v30  ;;  %v859_v33 = vld [vmem:[%s3526_s7] sm:$0xff] }
 0x18e   :  { %2467 = vmatpush3.bf16.msra.mxu1 %v2466_v29  ;;  %v474_v49 = vcombine.high %v3211_v42, %v3211_v42  ;;  %v3228_v51 = vrot.slane %v459_v43, %v2894_v2  ;;  %v3322_v29 = vpack.c.bf16 %v860_v34, %v859_v33 }
 0x18f   :  { %2469 = vmatprep.subr.bf16.mxu1 %v2468_v37  ;;  %v2697_v37 = vmov 0.0  }
 0x190   :  { %2499 = vmatpush3.bf16.msra.mxu0 %v2498_v41  ;;  %688 = vmatprep.mubr.f32.mxu1 %v474_v49  ;;  %v475_v2 = vcombine.high %v3228_v51, %v3228_v51  ;;  %v1977_v41 = vld [vmem:[%s3523_s4] ss:$0 sm:$0xff]  ;;  %s2698_s4 = smov 32  }
 0x191   :  { %2501 = vmatprep.subr.bf16.mxu0 %v2500_v46 }
 0x192   :  { %2471 = vmatpush3.bf16.msra.mxu1 %v2470_v50  ;;  %758 = vmatprep.mubr.f32.mxu0 %v475_v2  ;;  %v1978_v2 = vld [vmem:[%s3527_s8] ss:$0 sm:$0xff] }
 0x193   :  { %2473 = vmatprep.subr.bf16.mxu1 %v2472_v54 }
 0x194   :  { %2503 = vmatpush3.bf16.msra.mxu0 %v2502_v57 }
 0x195   :  { %2505 = vmatprep.subr.bf16.mxu0 %v2504_v60 }
 0x196   :  { %2475 = vmatpush3.bf16.msra.mxu1 %v2474_v63 }
 0x197   :  { %2477 = vmatprep.subr.bf16.mxu1 %v2476_v3 }
 0x198   :  { %2507 = vmatpush3.bf16.msra.mxu0 %v2506_v6 }
 0x199   :  { %2509 = vmatprep.subr.bf16.mxu0 %v2508_v9 }
 0x19a   :  { %2479 = vmatpush3.bf16.msra.mxu1 %v2478_v12 }
 0x19b   :  { %2481 = vmatprep.subr.bf16.mxu1 %v2480_v15 }
 0x19c   :  { %2511 = vmatpush3.bf16.msra.mxu0 %v2510_v18 }
 0x19d   :  { %2513 = vmatprep.subr.bf16.mxu0 %v2512_v22 }
 0x19e   :  { %2483 = vmatpush3.bf16.msra.mxu1 %v2482_v25 }
 0x19f   :  { %2517 = vmatprep.subr.bf16.mxu1 %v2516_v26 }
 0x1a0   :  { %2515 = vmatpush3.bf16.msra.mxu0 %v2514_v27 }
 0x1a1   :  { %689 = vmatmul.mubr.f32.vlgmr.msra.gmra.mrb[2].mxu1 %v3211_v42  ;;  %2548 = vmatprep.subr.bf16.mxu0 %v2695_v28 }
 0x1a2   :  { %2519 = vmatpush3.bf16.msra.mxu1 %v2516_v26  ;;  %2244 = vmatprep.mubr.msk.f32.mxu1 %vm777_vm3, %v764_v32 }
 0x1a3   :  { %759 = vmatmul.mubr.f32.vlgmr.msra.gmra.mrb[4].mxu0 %v3228_v51  ;;  %2521 = vmatprep.subr.bf16.mxu1 %v2520_v19 }
 0x1a4   :  { %2550 = vmatpush3.bf16.msra.mxu0 %v3322_v29  ;;  %2299 = vmatprep.mubr.msk.f32.mxu0 %vm2696_vm4, %v2697_v37 }
 0x1a5   :  { %2551 = vmatprep.subr.bf16.mxu0 %v2695_v28 }
 0x1a6   :  { %2523 = vmatpush3.bf16.msra.mxu1 %v2520_v19 }
 0x1a7   :  { %2524 = vmatprep.subr.bf16.mxu1 %v2695_v28 }
 0x1a8   :  { %2553 = vmatpush3.bf16.msra.mxu0 %v3338_v39 }
 0x1a9   :  { %2245 = vmatmul.mubr.msk.f32.vlgmr.msra.gmra.mrb[4].mxu1 %vm777_vm3, %v765_v38  ;;  %2560 = vmatprep.subr.bf16.mxu0 %v2695_v28 }
 0x1aa   :  { %2526 = vmatpush3.bf16.msra.mxu1 %v3322_v29  ;;  %2255 = vmatprep.mubr.msk.f32.mxu1 %vm2696_vm4, %v2697_v37 }
 0x1ab   :  { %2527 = vmatprep.subr.bf16.mxu1 %v2695_v28 }
 0x1ae   :  { %2529 = vmatpush3.bf16.msra.mxu1 %v3338_v39 }
 0x1af   :  { %2530 = vmatprep.subr.bf16.mxu1 %v2695_v28 }
 0x1b1   :  { %2256 = vmatmul.mubr.f32.vlgmr.msra.gmra.mrb[6].mxu1 %v2697_v37 }
 0x1b2   :  { %2532 = vmatpush3.bf16.msra.mxu1 %v3322_v29  ;;  %2266 = vmatprep.mubr.msk.f32.mxu1 %vm2696_vm4, %v2697_v37 }
 0x1b3   :  { %2533 = vmatprep.subr.bf16.mxu1 %v2695_v28 }
 0x1b6   :  { %2535 = vmatpush3.bf16.msra.mxu1 %v3338_v39 }
 0x1b7   :  { %2536 = vmatprep.subr.bf16.mxu1 %v2695_v28 }
 0x254   :  { %v2044_v40 = vpop.f32.mrb[0].mxu1 }
 0x255   :  { %v2045_v42 = vpop.f32.mrb[1].mxu1 }
 0x256   :  { %v2046_v43 = vadd.f32 %v2045_v42, %v2044_v40  ;;  %v2079_v44 = vpop.f32.mrb[2].mxu0 }
 0x257   :  { %v2080_v45 = vpop.f32.mrb[3].mxu0 }
 0x258   :  { %v551_v46 = vadd.f32 %v2046_v43, %v1977_v41  ;;  %v2081_v47 = vadd.f32 %v2080_v45, %v2079_v44 }
 0x25a   :  { %v621_v48 = vadd.f32 %v2081_v47, %v551_v46 }
 0x274   :  { %v2114_v49 = vpop.f32.mrb[2].mxu1 }
 0x275   :  { %v2115_v50 = vpop.f32.mrb[3].mxu1 }
 0x276   :  { %v2116_v51 = vadd.f32 %v2115_v50, %v2114_v49  ;;  %v2149_v52 = vpop.f32.mrb[4].mxu0 }
 0x277   :  { %v2150_v53 = vpop.f32.mrb[5].mxu0 }
 0x278   :  { %v691_v54 = vadd.f32 %v2116_v51, %v621_v48  ;;  %v2151_v55 = vadd.f32 %v2150_v53, %v2149_v52 }
 0x27a   :  { %v3360_v56 = vadd.f32 %v2151_v55, %v691_v54 }
 0x27c   :  { %v2246_v57 = vpop.f32.mrb[4].mxu1 }
 0x27d   :  { %v3365_v58 = vadd.f32 %v2246_v57, %v1978_v2  ;;  %v850_v59 = vpop.f32.mrb[5].mxu1 }
 0x27e   :  { %v3367_v60 = vadd.f32 %v1978_v2, %v850_v59 }
 0x284   :  { %v932_v61 = vpop.f32.mrb[6].mxu1 }
 0x285   :  { %v936_v62 = vadd.f32 %v932_v61, %v3367_v60  ;;  %v2257_v63 = vpop.f32.mrb[7].mxu1 }
 0x287   :  { %2604 = vtanh.f32 %v936_v62  ;;  %v1981_v1 = vmul.f32 -1.442695, %v936_v62 }
 0x289   :  { %2606 = vpow2.f32 %v1981_v1 }
 0x291   :  { %v2605_v0 = vpop.eup %2604 }
 0x292   :  { %946 = vrot.lane.b32.xlu0 %v2605_v0, %s2694_s26 }
 0x293   :  { %v2607_v3 = vpop.eup %2606 }
 0x294   :  { %v940_v4 = vadd.f32 1.0, %v2607_v3 }
 0x296   :  { %2608 = vrcp.f32 %v940_v4 }
 0x2a0   :  { %v2609_v5 = vpop.eup %2608 }
 0x2a1   :  { %v944_v8 = vmul.f32 0.0, %v2609_v5 }
 0x304   :  { %v947_v6 = vpop.permute.xlu0 %946 }
 0x305   :  { %v949_v7 = vmul.f32 %v2609_v5, %v947_v6 }
 0x307   :  { %951 = vrot.lane.b32.xlu1 %v949_v7, %s2698_s4 }
 0x379   :  { %v952_v9 = vpop.permute.xlu1 %951 }
 0x37a   :  { %v954_v10 = vadd.f32 %v952_v9, %v944_v8 }
 0x37c   :  { %2610 = vtanh.f32 %v954_v10  ;;  %v1048_v27 = vrot.slane %v954_v10, 6 }
 0x386   :  { %v2611_v11 = vpop.eup %2610 }
 0x387   :  { %957 = vrot.lane.b32.xlu0 %v2611_v11, %s2694_s26 }
 0x3f9   :  { %v958_v12 = vpop.permute.xlu0 %957 }
 0x3fa   :  { %v960_v13 = vmul.f32 %v2609_v5, %v958_v12 }
 0x3fc   :  { %962 = vrot.lane.b32.xlu1 %v960_v13, %s2698_s4 }
 0x46e   :  { %v963_v14 = vpop.permute.xlu1 %962 }
 0x46f   :  { %2267 = vmatmul.mubr.msk.f32.vlgmr.msra.gmra.mrb[8].mxu1 %vm777_vm3, %v963_v14 }
 0x470   :  { %2538 = vmatpush3.bf16.msra.mxu1 %v3322_v29  ;;  %2277 = vmatprep.mubr.msk.f32.mxu1 %vm2696_vm4, %v2697_v37 }
 0x471   :  { %2539 = vmatprep.subr.bf16.mxu1 %v2695_v28 }
 0x474   :  { %2541 = vmatpush3.bf16.msra.mxu1 %v3338_v39 }
 0x475   :  { %2542 = vmatprep.subr.bf16.mxu1 %v2695_v28 }
 0x542   :  { %v1032_v15 = vpop.f32.mrb[8].mxu1 }
 0x543   :  { %v1037_v16 = vrot.slane %v1032_v15, 6  ;;  %v2268_v17 = vpop.f32.mrb[9].mxu1 }
 0x545   :  { %v1039_v18 = vadd.f32 %v1037_v16, %v3367_v60 }
 0x547   :  { %2612 = vtanh.f32 %v1039_v18  ;;  %v1983_v21 = vmul.f32 -1.442695, %v1039_v18 }
 0x549   :  { %2614 = vpow2.f32 %v1983_v21 }
 0x551   :  { %v2613_v20 = vpop.eup %2612 }
 0x552   :  { %1052 = vrot.lane.b32.xlu0 %v2613_v20, %s2694_s26 }
 0x553   :  { %v2615_v22 = vpop.eup %2614 }
 0x554   :  { %v1043_v23 = vadd.f32 1.0, %v2615_v22 }
 0x556   :  { %2616 = vrcp.f32 %v1043_v23 }
 0x560   :  { %v2617_v24 = vpop.eup %2616 }
 0x561   :  { %v1050_v30 = vmul.f32 %v2617_v24, %v1048_v27 }
 0x5c4   :  { %v1053_v25 = vpop.permute.xlu0 %1052 }
 0x5c5   :  { %v1055_v26 = vmul.f32 %v2617_v24, %v1053_v25 }
 0x5c7   :  { %1057 = vrot.lane.b32.xlu1 %v1055_v26, %s2698_s4 }
 0x639   :  { %v1058_v31 = vpop.permute.xlu1 %1057 }
 0x63a   :  { %v1060_v19 = vadd.f32 %v1058_v31, %v1050_v30 }
 0x63c   :  { %2618 = vtanh.f32 %v1060_v19  ;;  %v1155_v50 = vrot.slane %v1060_v19, 6 }
 0x646   :  { %v2619_v32 = vpop.eup %2618 }
 0x647   :  { %1063 = vrot.lane.b32.xlu0 %v2619_v32, %s2694_s26 }
 0x6b9   :  { %v1064_v33 = vpop.permute.xlu0 %1063 }
 0x6ba   :  { %v1066_v34 = vmul.f32 %v2617_v24, %v1064_v33 }
 0x6bc   :  { %v1068_v35 = vrot.slane %v1066_v34, 2 }
 0x6be   :  { %1069 = vrot.lane.b32.xlu1 %v1068_v35, %s2698_s4 }
 0x730   :  { %v1070_v36 = vpop.permute.xlu1 %1069 }
 0x731   :  { %2278 = vmatmul.mubr.msk.f32.vlgmr.msra.gmra.mrb[10].mxu1 %vm777_vm3, %v1070_v36 }
 0x732   :  { %2544 = vmatpush3.bf16.msra.mxu1 %v3322_v29  ;;  %2288 = vmatprep.mubr.msk.f32.mxu1 %vm2696_vm4, %v2697_v37 }
 0x733   :  { %2545 = vmatprep.subr.bf16.mxu1 %v2695_v28 }
 0x736   :  { %2547 = vmatpush3.bf16.msra.mxu1 %v3338_v39 }
 0x737   :  { %2554 = vmatprep.subr.bf16.mxu1 %v2695_v28 }
 0x804   :  { %v1139_v38 = vpop.f32.mrb[10].mxu1 }
 0x805   :  { %v1144_v40 = vrot.slane %v1139_v38, 4  ;;  %v2279_v41 = vpop.f32.mrb[11].mxu1 }
 0x807   :  { %v1146_v42 = vadd.f32 %v1144_v40, %v3367_v60 }
 0x809   :  { %2620 = vtanh.f32 %v1146_v42  ;;  %v1985_v44 = vmul.f32 -1.442695, %v1146_v42 }
 0x80b   :  { %2622 = vpow2.f32 %v1985_v44 }
 0x813   :  { %v2621_v43 = vpop.eup %2620 }
 0x814   :  { %1159 = vrot.lane.b32.xlu0 %v2621_v43, %s2694_s26 }
 0x815   :  { %v2623_v45 = vpop.eup %2622 }
 0x816   :  { %v1150_v46 = vadd.f32 1.0, %v2623_v45 }
 0x818   :  { %2624 = vrcp.f32 %v1150_v46 }
 0x822   :  { %v2625_v47 = vpop.eup %2624 }
 0x823   :  { %v1157_v51 = vmul.f32 %v2625_v47, %v1155_v50 }
 0x886   :  { %v1160_v48 = vpop.permute.xlu0 %1159 }
 0x887   :  { %v1162_v49 = vmul.f32 %v2625_v47, %v1160_v48 }
 0x889   :  { %1164 = vrot.lane.b32.xlu1 %v1162_v49, %s2698_s4 }
 0x8fb   :  { %v1165_v52 = vpop.permute.xlu1 %1164 }
 0x8fc   :  { %v1167_v53 = vadd.f32 %v1165_v52, %v1157_v51 }
 0x8fe   :  { %2626 = vtanh.f32 %v1167_v53  ;;  %v1262_v9 = vrot.slane %v1167_v53, 6 }
 0x908   :  { %v2627_v54 = vpop.eup %2626 }
 0x909   :  { %1170 = vrot.lane.b32.xlu0 %v2627_v54, %s2694_s26 }
 0x97b   :  { %v1171_v55 = vpop.permute.xlu0 %1170 }
 0x97c   :  { %v1173_v2 = vmul.f32 %v2625_v47, %v1171_v55 }
 0x97e   :  { %v1175_v57 = vrot.slane %v1173_v2, 4 }
 0x980   :  { %1176 = vrot.lane.b32.xlu1 %v1175_v57, %s2698_s4 }
 0x9f2   :  { %v1177_v59 = vpop.permute.xlu1 %1176 }
 0x9f3   :  { %2289 = vmatmul.mubr.msk.f32.vlgmr.msra.gmra.mrb[12].mxu1 %vm777_vm3, %v1177_v59 }
 0x9f4   :  { %2556 = vmatpush3.bf16.msra.mxu1 %v3322_v29  ;;  %2310 = vmatprep.mubr.msk.f32.mxu1 %vm2696_vm4, %v2697_v37 }
 0x9f5   :  { %2557 = vmatprep.subr.bf16.mxu1 %v2695_v28 }
 0x9f8   :  { %2559 = vmatpush3.bf16.msra.mxu1 %v3338_v39 }
 0x9f9   :  { %2566 = vmatprep.subr.bf16.mxu1 %v2695_v28 }
 0xac6   :  { %v1246_v61 = vpop.f32.mrb[12].mxu1 }
 0xac7   :  { %v1251_v62 = vrot.slane %v1246_v61, 2  ;;  %v2290_v63 = vpop.f32.mrb[13].mxu1 }
 0xac9   :  { %v1253_v0 = vadd.f32 %v1251_v62, %v3367_v60 }
 0xacb   :  { %2628 = vtanh.f32 %v1253_v0  ;;  %v1987_v3 = vmul.f32 -1.442695, %v1253_v0 }
 0xacd   :  { %2630 = vpow2.f32 %v1987_v3 }
 0xad5   :  { %v2629_v1 = vpop.eup %2628 }
 0xad6   :  { %1266 = vrot.lane.b32.xlu0 %v2629_v1, %s2694_s26 }
 0xad7   :  { %v2631_v4 = vpop.eup %2630 }
 0xad8   :  { %v1257_v5 = vadd.f32 1.0, %v2631_v4 }
 0xada   :  { %2632 = vrcp.f32 %v1257_v5 }
 0xae4   :  { %v2633_v6 = vpop.eup %2632 }
 0xae5   :  { %v1264_v10 = vmul.f32 %v2633_v6, %v1262_v9 }
 0xb48   :  { %v1267_v7 = vpop.permute.xlu0 %1266 }
 0xb49   :  { %v1269_v8 = vmul.f32 %v2633_v6, %v1267_v7 }
 0xb4b   :  { %1271 = vrot.lane.b32.xlu1 %v1269_v8, %s2698_s4 }
 0xbbd   :  { %v1272_v11 = vpop.permute.xlu1 %1271 }
 0xbbe   :  { %v1274_v12 = vadd.f32 %v1272_v11, %v1264_v10 }
 0xbc0   :  { %2634 = vtanh.f32 %v1274_v12  ;;  %v1366_v30 = vrot.slane %v1274_v12, 6 }
 0xbca   :  { %v2635_v60 = vpop.eup %2634 }
 0xbcb   :  { %1277 = vrot.lane.b32.xlu0 %v2635_v60, %s2694_s26 }
 0xc3d   :  { %v1278_v13 = vpop.permute.xlu0 %1277 }
 0xc3e   :  { %v1280_v14 = vmul.f32 %v2633_v6, %v1278_v13 }
 0xc40   :  { %v1282_v15 = vrot.slane %v1280_v14, 6  ;;  %v1705_v14 = vld [vmem:[%s3528_s9] sm:$0xff] }
 0xc42   :  { %1283 = vrot.lane.b32.xlu1 %v1282_v15, %s2698_s4  ;;  %v1706_v15 = vld [vmem:[%s3528_s9 + $0x8] sm:$0xff] }
 0xcb4   :  { %v1284_v16 = vpop.permute.xlu1 %1283 }
 0xcb5   :  { %2300 = vmatmul.mubr.msk.f32.vlgmr.msra.gmra.mrb[6].mxu0 %vm777_vm3, %v1284_v16  ;;  %v2579_v16 = vpack.c.bf16 %v1706_v15, %v1705_v14 }
 0xcb6   :  { %2562 = vmatpush3.bf16.msra.mxu0 %v3322_v29  ;;  %2321 = vmatprep.mubr.msk.f32.mxu0 %vm2696_vm4, %v2697_v37 }
 0xcb7   :  { %2563 = vmatprep.subr.bf16.mxu0 %v2695_v28 }
 0xcba   :  { %2565 = vmatpush3.bf16.msra.mxu0 %v3338_v39 }
 0xcbb   :  { %2572 = vmatprep.subr.bf16.mxu0 %v2695_v28 }
 0xd88   :  { %v1353_v17 = vpop.f32.mrb[6].mxu0 }
 0xd89   :  { %v1357_v18 = vadd.f32 %v1353_v17, %v3365_v58  ;;  %v2301_v20 = vpop.f32.mrb[7].mxu0 }
 0xd8b   :  { %2636 = vtanh.f32 %v1357_v18  ;;  %v1989_v22 = vmul.f32 -1.442695, %v1357_v18 }
 0xd8d   :  { %2638 = vpow2.f32 %v1989_v22 }
 0xd95   :  { %v2637_v21 = vpop.eup %2636 }
 0xd96   :  { %1370 = vrot.lane.b32.xlu0 %v2637_v21, %s2694_s26 }
 0xd97   :  { %v2639_v23 = vpop.eup %2638 }
 0xd98   :  { %v1361_v24 = vadd.f32 1.0, %v2639_v23 }
 0xd9a   :  { %2640 = vrcp.f32 %v1361_v24 }
 0xda4   :  { %v2641_v25 = vpop.eup %2640 }
 0xda5   :  { %v1368_v31 = vmul.f32 %v2641_v25, %v1366_v30 }
 0xe08   :  { %v1371_v26 = vpop.permute.xlu0 %1370 }
 0xe09   :  { %v1373_v27 = vmul.f32 %v2641_v25, %v1371_v26 }
 0xe0b   :  { %1375 = vrot.lane.b32.xlu1 %v1373_v27, %s2698_s4 }
 0xe7d   :  { %v1376_v19 = vpop.permute.xlu1 %1375 }
 0xe7e   :  { %v1378_v32 = vadd.f32 %v1376_v19, %v1368_v31 }
 0xe80   :  { %2642 = vtanh.f32 %v1378_v32 }
 0xe8a   :  { %v2643_v33 = vpop.eup %2642 }
 0xe8b   :  { %1381 = vrot.lane.b32.xlu0 %v2643_v33, %s2694_s26 }
 0xefd   :  { %v1382_v34 = vpop.permute.xlu0 %1381 }
 0xefe   :  { %v1384_v35 = vmul.f32 %v2641_v25, %v1382_v34 }
 0xf00   :  { %1386 = vrot.lane.b32.xlu1 %v1384_v35, %s2698_s4  ;;  %v1707_v35 = vld [vmem:[%s3529_s10] sm:$0xff] }
 0xf72   :  { %v1387_v36 = vpop.permute.xlu1 %1386 }
 0xf73   :  { %2311 = vmatmul.mubr.msk.f32.vlgmr.msra.gmra.mrb[14].mxu1 %vm777_vm3, %v1387_v36  ;;  %v1708_v36 = vld [vmem:[%s3529_s10 + $0x8] sm:$0xff] }
 0xf74   :  { %2568 = vmatpush3.bf16.msra.mxu1 %v3322_v29  ;;  %2332 = vmatprep.mubr.msk.f32.mxu1 %vm2696_vm4, %v2697_v37 }
 0xf75   :  { %2569 = vmatprep.subr.bf16.mxu1 %v2695_v28 }
 0xf78   :  { %2571 = vmatpush3.bf16.msra.mxu1 %v3338_v39  ;;  %v1472_v39 = vrot.slane %v1378_v32, 6 }
 0xf79   :  { %2578 = vmatprep.subr.bf16.mxu1 %v2695_v28 }
0x1046   :  { %v1456_v38 = vpop.f32.mrb[14].mxu1 }
0x1047   :  { %v1461_v40 = vrot.slane %v1456_v38, 6  ;;  %v2312_v41 = vpop.f32.mrb[15].mxu1  ;;  %v1709_v38 = vld [vmem:[%s3529_s10 + $0x10] sm:$0xff] }
0x1048   :  { %v1710_v41 = vld [vmem:[%s3529_s10 + $0x18] sm:$0xff] }
0x1049   :  { %v1463_v42 = vadd.f32 %v1461_v40, %v3365_v58  ;;  %v2573_v40 = vpack.c.bf16 %v1708_v36, %v1707_v35 }
0x104b   :  { %2644 = vtanh.f32 %v1463_v42  ;;  %v1991_v44 = vmul.f32 -1.442695, %v1463_v42  ;;  %v2576_v42 = vpack.c.bf16 %v1710_v41, %v1709_v38 }
0x104d   :  { %2646 = vpow2.f32 %v1991_v44 }
0x1055   :  { %v2645_v43 = vpop.eup %2644 }
0x1056   :  { %1476 = vrot.lane.b32.xlu0 %v2645_v43, %s2694_s26 }
0x1057   :  { %v2647_v29 = vpop.eup %2646 }
0x1058   :  { %v1467_v45 = vadd.f32 1.0, %v2647_v29 }
0x105a   :  { %2648 = vrcp.f32 %v1467_v45 }
0x1064   :  { %v2649_v46 = vpop.eup %2648 }
0x1065   :  { %v1474_v49 = vmul.f32 %v2649_v46, %v1472_v39  ;;  %v1872_v39 = vld [vmem:[%s3531_s12 + $0x10] sm:$0xff] }
0x10c8   :  { %v1477_v47 = vpop.permute.xlu0 %1476 }
0x10c9   :  { %v1479_v48 = vmul.f32 %v2649_v46, %v1477_v47  ;;  %v1871_v47 = vld [vmem:[%s3531_s12 + $0x8] sm:$0xff] }
0x10cb   :  { %1481 = vrot.lane.b32.xlu1 %v1479_v48, %s2698_s4 }
0x113d   :  { %v1482_v50 = vpop.permute.xlu1 %1481 }
0x113e   :  { %v1484_v51 = vadd.f32 %v1482_v50, %v1474_v49  ;;  %v1873_v49 = vld [vmem:[%s3531_s12 + $0x18] sm:$0xff] }
0x1140   :  { %2650 = vtanh.f32 %v1484_v51  ;;  %v1579_v7 = vrot.slane %v1484_v51, 6  ;;  %v2585_v51 = vpack.c.bf16 %v1873_v49, %v1872_v39 }
0x114a   :  { %v2651_v52 = vpop.eup %2650 }
0x114b   :  { %1487 = vrot.lane.b32.xlu0 %v2651_v52, %s2694_s26  ;;  %v1874_v52 = vld [vmem:[%s3531_s12 + $0x20] sm:$0xff] }
0x11bd   :  { %v1488_v53 = vpop.permute.xlu0 %1487 }
0x11be   :  { %v1490_v54 = vmul.f32 %v2649_v46, %v1488_v53  ;;  %v1870_v46 = vld [vmem:[%s3531_s12] sm:$0xff]  ;;  %v1875_v53 = vld [vmem:[%s3531_s12 + $0x28] sm:$0xff] }
0x11bf   :  { %v2582_v48 = vpack.c.bf16 %v1871_v47, %v1870_v46 }
0x11c0   :  { %v1492_v55 = vrot.slane %v1490_v54, 2  ;;  %v2588_v54 = vpack.c.bf16 %v1875_v53, %v1874_v52 }
0x11c2   :  { %1493 = vrot.lane.b32.xlu1 %v1492_v55, %s2698_s4  ;;  %v1877_v55 = vld [vmem:[%s3531_s12 + $0x38] sm:$0xff] }
0x1234   :  { %v1494_v2 = vpop.permute.xlu1 %1493 }
0x1235   :  { %2322 = vmatmul.mubr.msk.f32.vlgmr.msra.gmra.mrb[8].mxu0 %vm777_vm3, %v1494_v2 }
0x1236   :  { %2343 = vmatprep.mubr.msk.f32.mxu0 %vm2696_vm4, %v2697_v37  ;;  %2574 = vmatpush3.bf16.msra.mxu0 %v2573_v40 }
0x1237   :  { %2575 = vmatprep.subr.bf16.mxu0 %v2695_v28 }
0x123a   :  { %2577 = vmatpush3.bf16.msra.mxu0 %v2576_v42 }
0x123b   :  { %2581 = vmatprep.subr.bf16.mxu0 %v2695_v28 }
0x1308   :  { %v1563_v57 = vpop.f32.mrb[8].mxu0 }
0x1309   :  { %v1568_v59 = vrot.slane %v1563_v57, 4  ;;  %v2323_v61 = vpop.f32.mrb[9].mxu0 }
0x130b   :  { %v1570_v62 = vadd.f32 %v1568_v59, %v3365_v58  ;;  %v1998_v59 = vld [vmem:[%s3530_s11] ss:$0 sm:$0xff] }
0x130d   :  { %2652 = vtanh.f32 %v1570_v62  ;;  %v1993_v0 = vmul.f32 -1.442695, %v1570_v62 }
0x130f   :  { %2654 = vpow2.f32 %v1993_v0  ;;  %v1999_v0 = vld [vmem:[%s3532_s13] ss:$0 sm:$0xff] }
0x1317   :  { %v2653_v63 = vpop.eup %2652 }
0x1318   :  { %1583 = vrot.lane.b32.xlu0 %v2653_v63, %s2694_s26 }
0x1319   :  { %v2655_v1 = vpop.eup %2654 }
0x131a   :  { %v1574_v3 = vadd.f32 1.0, %v2655_v1 }
0x131c   :  { %2656 = vrcp.f32 %v1574_v3 }
0x1326   :  { %v2657_v4 = vpop.eup %2656 }
0x1327   :  { %v1581_v8 = vmul.f32 %v2657_v4, %v1579_v7 }
0x138a   :  { %v1584_v5 = vpop.permute.xlu0 %1583 }
0x138b   :  { %v1586_v6 = vmul.f32 %v2657_v4, %v1584_v5 }
0x138d   :  { %1588 = vrot.lane.b32.xlu1 %v1586_v6, %s2698_s4 }
0x13ff   :  { %v1589_v9 = vpop.permute.xlu1 %1588 }
0x1400   :  { %v1591_v10 = vadd.f32 %v1589_v9, %v1581_v8 }
0x1402   :  { %2658 = vtanh.f32 %v1591_v10 }
0x140c   :  { %v2659_v11 = vpop.eup %2658 }
0x140d   :  { %1594 = vrot.lane.b32.xlu0 %v2659_v11, %s2694_s26 }
0x147f   :  { %v1595_v12 = vpop.permute.xlu0 %1594 }
0x1480   :  { %v1597_v60 = vmul.f32 %v2657_v4, %v1595_v12 }
0x1482   :  { %v1599_v13 = vrot.slane %v1597_v60, 4 }
0x1484   :  { %1600 = vrot.lane.b32.xlu1 %v1599_v13, %s2698_s4 }
0x14f6   :  { %v1601_v17 = vpop.permute.xlu1 %1600 }
0x14f7   :  { %2333 = vmatmul.mubr.msk.f32.vlgmr.msra.gmra.mrb[16].mxu1 %vm777_vm3, %v1601_v17 }
0x14f8   :  { %2580 = vmatpush3.bf16.msra.mxu1 %v2579_v16  ;;  %2350 = vmatprep.mubr.msk.f32.mxu1 %vm2696_vm4, %v2697_v37 }
0x14fb   :  { %2351 = vmatmul.mubr.msk.f32.vlgmr.msra.gmra.mrb[18].mxu1 %vm1787_vm5, %v3360_v56  ;;  %v1686_v56 = vrot.slane %v1591_v10, 6 }
0x15ca   :  { %v1670_v18 = vpop.f32.mrb[16].mxu1 }
0x15cb   :  { %v1675_v20 = vrot.slane %v1670_v18, 2  ;;  %v2334_v21 = vpop.f32.mrb[17].mxu1 }
0x15cd   :  { %v1677_v22 = vadd.f32 %v1675_v20, %v3365_v58 }
0x15ce   :  { %v1857_v23 = vpop.f32.mrb[18].mxu1 }
0x15cf   :  { %2660 = vtanh.f32 %v1677_v22  ;;  %v2352_v24 = vpop.f32.mrb[19].mxu1  ;;  %v1995_v26 = vmul.f32 -1.442695, %v1677_v22 }
0x15d1   :  { %2662 = vpow2.f32 %v1995_v26 }
0x15d9   :  { %v2661_v25 = vpop.eup %2660 }
0x15da   :  { %1690 = vrot.lane.b32.xlu0 %v2661_v25, %s2694_s26 }
0x15db   :  { %v2663_v27 = vpop.eup %2662 }
0x15dc   :  { %v1681_v30 = vadd.f32 1.0, %v2663_v27 }
0x15de   :  { %2664 = vrcp.f32 %v1681_v30 }
0x15e8   :  { %v2665_v31 = vpop.eup %2664 }
0x15e9   :  { %v1688_v33 = vmul.f32 %v2665_v31, %v1686_v56 }
0x164c   :  { %v1691_v19 = vpop.permute.xlu0 %1690 }
0x164d   :  { %v1693_v32 = vmul.f32 %v2665_v31, %v1691_v19 }
0x164f   :  { %1695 = vrot.lane.b32.xlu1 %v1693_v32, %s2698_s4 }
0x16c1   :  { %v1696_v34 = vpop.permute.xlu1 %1695 }
0x16c2   :  { %v1698_v58 = vadd.f32 %v1696_v34, %v1688_v33 }
0x16c4   :  { %2666 = vtanh.f32 %v1698_v58 }
0x16ce   :  { %v2667_v43 = vpop.eup %2666 }
0x16cf   :  { %1701 = vrot.lane.b32.xlu0 %v2667_v43, %s2694_s26 }
0x1741   :  { %v1702_v44 = vpop.permute.xlu0 %1701 }
0x1742   :  { %v1704_v29 = vmul.f32 %v2665_v31, %v1702_v44 }
0x1744   :  { %v1712_v45 = vrot.slane %v1704_v29, 6 }
0x1746   :  { %1713 = vrot.lane.b32.xlu1 %v1712_v45, %s2698_s4 }
0x17b8   :  { %v1714_v50 = vpop.permute.xlu1 %1713 }
0x17b9   :  { %2344 = vmatmul.mubr.msk.f32.vlgmr.msra.gmra.mrb[10].mxu0 %vm777_vm3, %v1714_v50 }
0x17ba   :  { %2583 = vmatpush3.bf16.msra.mxu0 %v2582_v48  ;;  %2369 = vmatprep.mubr.msk.f32.mxu0 %vm2696_vm4, %v2697_v37  ;;  %v1876_v37 = vld [vmem:[%s3531_s12 + $0x30] sm:$0xff]  ;;  %s2668_s12 = scalar_lea.vmem %s1968_s28, 32 }
0x17bb   :  { %2584 = vmatprep.subr.bf16.mxu0 %v2695_v28  ;;  %v2591_v2 = vpack.c.bf16 %v1877_v55, %v1876_v37  ;;  %p2669_p0 = scmp.ne.s32.totalorder %s1968_s28, %s2668_s12  ;;  %p2674_p2 = scmp.lt.s32.totalorder %s2668_s12, %s2668_s12 }
0x17bd   :  { %p2675_p3 = por %p2674_p2, %p2673_p1 }
0x17be   :  { %2586 = vmatpush3.bf16.msra.mxu0 %v2585_v51 }
0x17bf   :  { %2587 = vmatprep.subr.bf16.mxu0 %v2695_v28  ;;  %p2676_p4 = pnand %p2675_p3, %p2669_p0 }
0x17c2   :  { %2589 = vmatpush3.bf16.msra.mxu0 %v2588_v54 }
0x17c3   :  { %2590 = vmatprep.subr.bf16.mxu0 %v2695_v28 }
0x17c6   :  { %2592 = vmatpush3.bf16.msra.mxu0 %v2591_v2 }
0x188c   :  { %v1783_v57 = vpop.f32.mrb[10].mxu0 }
0x188d   :  { %v1858_v61 = vadd.f32 %v1857_v23, %v1783_v57  ;;  %v2345_v62 = vpop.f32.mrb[11].mxu0 }
0x188f   :  { %v1868_v63 = vadd.f32 %v1998_v59, %v1858_v61 }
0x1891   :  { %v1869_v28 = vmax.f32 %v1868_v63, 0.0 }
0x1893   :  { %2370 = vmatmul.mubr.msk.f32.vlgmr.msra.gmra.mrb[12].mxu0 %vm1885_vm6, %v1869_v28 }
0x1966   :  { %v1955_v1 = vpop.f32.mrb[12].mxu0 }
0x1967   :  { %v1956_v3 = vadd.f32 %v1999_v0, %v1955_v1  ;;  %v2371_v4 = vpop.f32.mrb[13].mxu0 }
0x1969   :  { %1960 = vst.msk [vmem:[#allocation3] sm:$0x3] %vm1959_vm7, %v1956_v3 }
0x196a   :  { %2679 = shalt.err (!%p2676_p4)
}
0x196b   :  { %s2680_s29 = scalar_lea.hbm %s3533_s14, 32 }
0x196c   :  { %p2681_p5 = scmp.ne.s32.totalorder %s3533_s14, %s2680_s29  ;;  %p2684_p6 = scmp.lt.u32.totalorder %s2680_s29, %s3533_s14 }
0x196e   :  { %p2686_p7 = pnand %p2684_p6, %p2681_p5 }
0x1970   :  { %2689 = shalt.err (!%p2686_p7)
}
0x1971   :  { %1970 = dma.vmem_to_hbm [thread:$0]  %s1968_s28, 32, %s3533_s14, [#allocation4]  }
0x1972   :  { %2690 = dma.done.wait [#allocation4], 32  }
0x1973   :  { %2691 = vsyncadd [#allocation4], 4294967264 }
0x1974   :  { %1974 = vsyncpa [#allocation4], 1 }

</bundles_post_ra>
